<compile_context>
chip_gen: v7x
topology: tpu7x:2x2x1
jax: 0.10.0
libtpu: 0.0.40
codegen_flags: <defaults>
</compile_context>

<pallas_src>
import functools
import math

import jax
import jax.numpy as jnp
from jax.experimental import pallas as pl
from jax.experimental.pallas import tpu as pltpu


def _round_up(x: int, m: int) -> int:
    return (x + m - 1) // m * m


def _divisor_tiles(padded: int, cap: int):
    """Multiples of 128 that divide `padded`, descending, capped at `cap`."""
    cap = max(128, min(cap, padded))
    ts = [t for t in range(128, cap + 1, 128) if padded % t == 0]
    return sorted(ts, reverse=True) if ts else [128]


def _vmem_budget_bytes() -> int:
    """Per-generation scoped-VMEM budget (v5e/v6e: 128 MiB phys, v7x: 64 MiB)."""
    try:
        phys = int(pltpu.get_tpu_info().vmem_capacity_bytes)
    except Exception:
        phys = 64 * 1024 * 1024  # assume v7x-class (smallest) if unknown
    return min(phys * 3 // 4, 96 * 1024 * 1024)


# --------------------------------------------------------------------------
# Kernels
# --------------------------------------------------------------------------
def _epilogue(y, bias, *, apply_layer_norm, apply_relu):
    y = y + bias.astype(jnp.float32)
    if apply_layer_norm:
        # TODO(synk): nn.LayerNorm affine gamma/beta omitted (identical at init).
        mean = jnp.mean(y, axis=-1, keepdims=True)
        var = jnp.mean(jnp.square(y - mean), axis=-1, keepdims=True)
        y = (y - mean) * jax.lax.rsqrt(var + 1e-5)
    if apply_relu:
        y = jnp.maximum(y, 0.0)
    return y


def _linear_kernel_1k(x_ref, w_ref, b_ref, o_ref, *, apply_layer_norm, apply_relu):
    """Single K step per output tile: no accumulator scratch, no pl.when."""
    y = jnp.dot(x_ref[...].astype(jnp.bfloat16), w_ref[...],
                preferred_element_type=jnp.float32)
    y = _epilogue(y, b_ref[...], apply_layer_norm=apply_layer_norm,
                  apply_relu=apply_relu)
    o_ref[...] = y.astype(o_ref.dtype)


def _linear_kernel_mk(x_ref, w_ref, b_ref, o_ref, acc_ref, *,
                      apply_layer_norm, apply_relu):
    """K tiled on grid axis 2 ('arbitrary'); f32 VMEM accumulator scratch."""
    k = pl.program_id(2)

    @pl.when(k == 0)
    def _init():
        acc_ref[...] = jnp.zeros_like(acc_ref)

    acc_ref[...] += jnp.dot(x_ref[...].astype(jnp.bfloat16), w_ref[...],
                            preferred_element_type=jnp.float32)

    @pl.when(k == pl.num_programs(2) - 1)
    def _finalize():
        y = _epilogue(acc_ref[...], b_ref[...], apply_layer_norm=apply_layer_norm,
                      apply_relu=apply_relu)
        o_ref[...] = y.astype(o_ref.dtype)


# --------------------------------------------------------------------------
# Wrapper
# --------------------------------------------------------------------------
def prepare_linear_params(w_t, b):
    """Cast W to bf16 and pad W/b to lane multiples ONCE (hoisted out of forward)."""
    d_in, d_out = w_t.shape
    kp, np_ = _round_up(d_in, 128), _round_up(d_out, 128)
    w_pad = jnp.pad(w_t.astype(jnp.bfloat16), ((0, kp - d_in), (0, np_ - d_out)))
    b_pad = jnp.pad(jnp.asarray(b, jnp.float32).reshape(1, d_out),
                    ((0, 0), (0, np_ - d_out)))
    return w_pad, b_pad, d_out


def linear_layer_forward(x, w_padded, b_padded, d_out, *, layer_norm=False,
                         activation_relu=True, out_dtype=None,
                         tm_cap=512, tn_cap=512, tk_cap=None):
    """x: (B, D_in) f32/bf16; w_padded: (Kp, Np) bf16; b_padded: (1, Np) f32."""
    B, d_in = x.shape
    Kp, Np = w_padded.shape
    assert d_in <= Kp and d_out <= Np
    out_dtype = out_dtype or x.dtype
    o_isz = jnp.dtype(out_dtype).itemsize

    # ---- tile selection ---------------------------------------------------
    if layer_norm:
        # LayerNorm statistics need the whole (unpadded) feature row in one tile.
        assert Np == d_out, "layer_norm path requires D_out % 128 == 0"
        tn = Np
    else:
        tn = _divisor_tiles(Np, tn_cap)[0]

    tm = min(tm_cap, _round_up(B, 16))       # 16-row sublane packing for bf16
    Bp = _round_up(B, tm)

    # Megacore rule (v7x has 2 TCs): guarantee >=2 parallel programs when
    # possible; split the axis whose extra re-stream (W for M-split, x for
    # N-split) is cheaper. On single-core chips the extra cost is tiny.
    if (Bp // tm) * (Np // tn) < 2:
        can_split_m = tm % 32 == 0 and B > tm // 2
        can_split_n = (not layer_norm) and tn % 256 == 0 and d_out > tn // 2
        if can_split_m and (Kp * Np <= Bp * Kp or not can_split_n):
            tm //= 2
        elif can_split_n:
            tn //= 2

    # x: pre-cast to bf16 only when re-read by >2 N tiles; otherwise keep the
    # original dtype in HBM and cast each tile in-kernel (one HBM pass saved).
    precast_x = (Np // tn) > 2
    x_isz = 2 if precast_x else jnp.dtype(x.dtype).itemsize

    budget = _vmem_budget_bytes()
    margin = budget - (2 << 20)

    def vmem_need(tm_, tk_, k_steps_):
        return (tm_ * tk_ * x_isz * 2            # x block, double-buffered
                + tk_ * tn * 2 * 2               # bf16 W block, double-buffered
                + tn * 4 * 2                     # bias block
                + tm_ * tn * o_isz * 2           # output block
                + (tm_ * tn * 4 if k_steps_ > 1 else 0))   # f32 accumulator

    # K tile: collapse the K grid axis when padded D_in fits the VMEM budget.
    tk_cap_eff = tk_cap if tk_cap is not None else Kp
    if Kp <= tk_cap_eff and vmem_need(tm, Kp, 1) <= margin:
        tk = Kp
    else:
        tk = 128
        for cand in _divisor_tiles(Kp, min(tk_cap_eff, 1024)):
            if vmem_need(tm, cand, 2) <= margin:
                tk = cand
                break
    k_steps = Kp // tk
    while vmem_need(tm, tk, k_steps) > margin and tm > 16:
        tm = max(16, tm // 2)
        Bp = _round_up(B, tm)
    if vmem_need(tm, tk, k_steps) > margin:
        raise ValueError("tile configuration does not fit the VMEM budget")
    Bp = _round_up(B, tm)

    # ---- operand prep (inside the jitted forward, fuses with any cast) -----
    x_in = x.astype(jnp.bfloat16) if precast_x else x
    if (Bp, Kp) != (B, d_in):
        x_in = jnp.pad(x_in, ((0, Bp - B), (0, Kp - d_in)))

    grid_mn = (Bp // tm, Np // tn)
    ep_kwargs = dict(apply_layer_norm=layer_norm, apply_relu=activation_relu)

    cost = pl.CostEstimate(
        flops=2 * Bp * Kp * Np,
        transcendentals=0,
        bytes_accessed=(grid_mn[1] * Bp * Kp * x_isz     # x re-read per N tile
                        + grid_mn[0] * Kp * Np * 2       # W re-read per M tile
                        + Np * 4 + Bp * Np * o_isz),
    )

    if k_steps == 1:
        out = pl.pallas_call(
            functools.partial(_linear_kernel_1k, **ep_kwargs),
            out_shape=jax.ShapeDtypeStruct((Bp, Np), out_dtype),
            grid_spec=pltpu.PrefetchScalarGridSpec(
                num_scalar_prefetch=0,
                grid=grid_mn,
                in_specs=[
                    pl.BlockSpec((tm, Kp), lambda i, j: (i, 0)),   # x tile
                    pl.BlockSpec((Kp, tn), lambda i, j: (0, j)),   # W tile
                    pl.BlockSpec((1, tn), lambda i, j: (0, j)),    # bias tile
                ],
                out_specs=pl.BlockSpec((tm, tn), lambda i, j: (i, j)),
            ),
            compiler_params=pltpu.CompilerParams(
                dimension_semantics=("parallel", "parallel"),
                vmem_limit_bytes=budget),
            cost_estimate=cost,
        )(x_in, w_padded, b_padded)
    else:
        out = pl.pallas_call(
            functools.partial(_linear_kernel_mk, **ep_kwargs),
            out_shape=jax.ShapeDtypeStruct((Bp, Np), out_dtype),
            grid_spec=pltpu.PrefetchScalarGridSpec(
                num_scalar_prefetch=0,
                grid=grid_mn + (k_steps,),
                in_specs=[
                    pl.BlockSpec((tm, tk), lambda i, j, k: (i, k)),
                    pl.BlockSpec((tk, tn), lambda i, j, k: (k, j)),
                    pl.BlockSpec((1, tn), lambda i, j, k: (0, j)),
                ],
                out_specs=pl.BlockSpec((tm, tn), lambda i, j, k: (i, j)),
                scratch_shapes=[pltpu.VMEM((tm, tn), jnp.float32)],
            ),
            compiler_params=pltpu.CompilerParams(
                dimension_semantics=("parallel", "parallel", "arbitrary"),
                vmem_limit_bytes=budget),
            cost_estimate=cost,
        )(x_in, w_padded, b_padded)

    if (Bp, Np) != (B, d_out):
        out = out[:B, :d_out]
    return out


def make_linear_layer(w_t, b, *, layer_norm=False, activation_relu=True,
                      out_dtype=None, **tile_kwargs):
    """Pre-cast/pad params once, return a jitted forward(x) closure."""
    w_pad, b_pad, d_out = prepare_linear_params(w_t, b)

    def fwd(x):
        return linear_layer_forward(x, w_pad, b_pad, d_out,
                                    layer_norm=layer_norm,
                                    activation_relu=activation_relu,
                                    out_dtype=out_dtype, **tile_kwargs)

    return jax.jit(fwd)


def init_linear_params(key, input_size, output_size):
    """Deterministic nn.Linear-style init: U(-1/sqrt(in), 1/sqrt(in))."""
    k_w, k_b = jax.random.split(key)
    bound = 1.0 / math.sqrt(input_size)
    # PyTorch stores weight as (out, in); keep it pre-transposed for the kernel.
    w = jax.random.uniform(k_w, (output_size, input_size), jnp.float32, -bound, bound)
    b = jax.random.uniform(k_b, (output_size,), jnp.float32, -bound, bound)
    return w.T, b.reshape(1, output_size)


if __name__ == "__main__":
    # TODO(synk): dropout / BatchNorm1d (training-mode running stats) are not
    # fused; they are disabled by default in the reference module.
    keys = jax.random.split(jax.random.PRNGKey(0), 6)

    def run_case(k_x, k_p, batch, d_in, d_out, **kw):
        x = jax.random.normal(k_x, (batch, d_in), jnp.float32)
        w_t, bias = init_linear_params(k_p, d_in, d_out)
        fwd = make_linear_layer(w_t, bias, layer_norm=False, activation_relu=True, **kw)
        out = jax.block_until_ready(fwd(x))
        # Reference with the same bf16 rounding of the matmul operands.
        xr = x.astype(jnp.bfloat16).astype(jnp.float32)
        wr = w_t.astype(jnp.bfloat16).astype(jnp.float32)
        ref = jnp.maximum(xr @ wr + bias, 0.0)
        assert out.shape == (batch, d_out), out.shape
        err = float(jnp.max(jnp.abs(out.astype(jnp.float32) - ref)))
        assert jnp.allclose(out.astype(jnp.float32), ref, atol=2e-3, rtol=2e-3), err
        return out

    # Single-K path (K collapsed, no scratch), parallel split for v7x megacore.
    run_case(keys[0], keys[1], 128, 1024, 256)

    # Small ragged case: wrapper pads to (16,128)x(128,128) tiles and crops back.
    run_case(keys[2], keys[3], 8, 32, 64)

    # Forced K-tiling exercises the accumulator (multi-K) kernel path.
    run_case(keys[4], keys[5], 64, 512, 256, tk_cap=128)

    print("KERNEL_OK")
</pallas_src>

<mosaic_0001>
module attributes {stable_mosaic.version = 11 : i64} {
  func.func @_linear_kernel_1k(%arg0: i32, %arg1: i32, %arg2: memref<128x1024xf32, #tpu.memory_space<vmem>>, %arg3: memref<1024x128xbf16, #tpu.memory_space<vmem>>, %arg4: memref<1x128xf32, #tpu.memory_space<vmem>>, %arg5: memref<128x128xf32, #tpu.memory_space<vmem>>) attributes {dimension_semantics = [#tpu.dimension_semantics<parallel>, #tpu.dimension_semantics<parallel>], iteration_bounds = array<i64: 1, 2>, scalar_prefetch = 0 : i64, scratch_operands = 0 : i64, tpu.core_type = #tpu.core_type<tc>, window_params = [{transform_indices = @transform_0, window_bounds = array<i64: 128, 1024>}, {transform_indices = @transform_1, window_bounds = array<i64: 1024, 128>}, {transform_indices = @transform_2, window_bounds = array<i64: 1, 128>}, {transform_indices = @transform_3, window_bounds = array<i64: 128, 128>}]} {
    %c0 = arith.constant 0 : index
    %c0_0 = arith.constant 0 : index
    %0 = vector.load %arg2[%c0, %c0_0] : memref<128x1024xf32, #tpu.memory_space<vmem>>, vector<128x1024xf32>
    %1 = arith.truncf %0 : vector<128x1024xf32> to vector<128x1024xbf16>
    %c0_1 = arith.constant 0 : index
    %c0_2 = arith.constant 0 : index
    %2 = vector.load %arg3[%c0_1, %c0_2] : memref<1024x128xbf16, #tpu.memory_space<vmem>>, vector<1024x128xbf16>
    %cst = arith.constant dense<0.000000e+00> : vector<128x128xf32>
    %3 = tpu.matmul %1, %2, %cst {dimension_numbers = #tpu.dot_dimension_numbers<[1], [0], [0], [1], [0, 0, 1, 1], [], []>} : vector<128x1024xbf16>, vector<1024x128xbf16>, vector<128x128xf32> -> vector<128x128xf32>
    %c0_3 = arith.constant 0 : index
    %c0_4 = arith.constant 0 : index
    %4 = vector.load %arg4[%c0_3, %c0_4] : memref<1x128xf32, #tpu.memory_space<vmem>>, vector<1x128xf32>
    %5 = vector.broadcast %4 : vector<1x128xf32> to vector<128x128xf32>
    %6 = arith.addf %3, %5 : vector<128x128xf32>
    %cst_5 = arith.constant 0.000000e+00 : f32
    %7 = vector.broadcast %cst_5 : f32 to vector<128x128xf32>
    %8 = arith.maximumf %6, %7 : vector<128x128xf32>
    %c0_6 = arith.constant 0 : index
    %c0_7 = arith.constant 0 : index
    %9 = vector.load %arg5[%c0_6, %c0_7] : memref<128x128xf32, #tpu.memory_space<vmem>>, vector<128x128xf32>
    tpu.vector_store %arg5[%c0_6, %c0_7], %8 {strides = array<i32>} : memref<128x128xf32, #tpu.memory_space<vmem>>, vector<128x128xf32>,
    return
  }
  func.func @transform_0(%arg0: i32, %arg1: i32) -> (i32, i32) {
    %c0_i32 = arith.constant 0 : i32
    %c0_i32_0 = arith.constant 0 : i32
    return %arg0, %c0_i32 : i32, i32
  }
  func.func @transform_1(%arg0: i32, %arg1: i32) -> (i32, i32) {
    %c0_i32 = arith.constant 0 : i32
    %c0_i32_0 = arith.constant 0 : i32
    return %c0_i32, %arg1 : i32, i32
  }
  func.func @transform_2(%arg0: i32, %arg1: i32) -> (i32, i32) {
    %c0_i32 = arith.constant 0 : i32
    %c0_i32_0 = arith.constant 0 : i32
    return %c0_i32, %arg1 : i32, i32
  }
  func.func @transform_3(%arg0: i32, %arg1: i32) -> (i32, i32) {
    %c0_i32 = arith.constant 0 : i32
    return %arg0, %arg1 : i32, i32
  }
}

</mosaic_0001>

<bundles_post_ra>
// kernel: fwd.1
= control target key start
LH: loop header
LB: loop body
LE: loop exit
PB: predicated region body
PF: predicated region fallthrough
CT: control target
= control target key end

     0   :  { %8 = vsyncpa [#allocation4], 0  ;;  %s3507_s0 = inlined_call_operand.vmem [shape: f32[128,1024], index: 0, kind: input, shape index: {}]   ;;  %s3508_s1 = inlined_call_operand.vmem [shape: bf16[1024,256], index: 1, kind: input, shape index: {}]   ;;  %s3509_s2 = inlined_call_operand.vmem [shape: f32[1,256], index: 2, kind: input, shape index: {}]   ;;  %s3510_s3 = inlined_call_operand.hbm [shape: f32[128,256], index: 3, kind: output, shape index: {}]  }
   0x1   :  { %10 = vsyncpa [#allocation4 + $0x1], 0  ;;  %s2583_s12 = smov 0   ;;  %s2585_s13 = smov 0  }
   0x2   :  { %s2587_s14 = smov 0   ;;  %s2589_s15 = smov 0  }
   0x3   :  { %s2591_s16 = smov 0   ;;  %s2593_s17 = smov 0  }
   0x4 LB: > { %s2022_s18 = sadd.s32 4294967295, %s2557_s17   ;;  %s2023_s19 = sadd.s32 4294967294, %s2557_s17   ;;  %s2557_s17 = sphi %s2593_s17, %s16_s17   ;;  %s2553_s16 = sphi %s2591_s16, %s3517_s16   ;;  %s2549_s15 = sphi %s2589_s15, %s3516_s15   ;;  %s2545_s14 = sphi %s2587_s14, %s3515_s14   ;;  %s2541_s13 = sphi %s2585_s13, %s3514_s13   ;;  %s2537_s12 = sphi %s2583_s12, %s3513_s12  }
   0x5   : > { %s25_s20 = sadd.s32 1, %s2553_s16  ;;  %s61_s21 = sadd.s32 1, %s2545_s14 }
   0x6   : > { %p26_p0 = scmp.ge.s32.totalorder %s25_s20, 2  ;;  %p68_p1 = scmp.ne.s32.totalorder %s2545_s14, %s2541_s13 }
   0x7   : > { %p69_p2 = scmp.eq.s32.totalorder %s2557_s17, 0  ;;  %p126_p3 = scmp.eq.s32.totalorder %s2022_s18, 1 }
   0x8   : > { %s3519_s20 = smov (%p26_p0, %s25_s20), 0  ;;  %p131_p6 = scmp.ne.s32.totalorder %s2541_s13, %s2537_s12 }
   0x9   : > { %p70_p4 = por %p69_p2, %p68_p1  ;;  %p2622_p5 = por %p126_p3, %p68_p1 }
   0xa   : > { %s58_s23 = ssub.s32 %s2553_s16, %s3519_s20  ;;  %p132_p8 = scmp.eq.s32.totalorder %s2023_s19, 1 }
   0xb   : > { %p59_p7 = scmp.eq.s32.totalorder %s58_s23, 0  ;;  %p2026_p10 = scmp.ge.s32.totalorder %s2557_s17, 2 }
   0xc   : > { %p2633_p9 = por %p132_p8, %p131_p6 }
   0xd   : > { %s2631_s24 = scalar_select %p59_p7, %s2545_s14, %s61_s21  }
   0xe   : > { %158 = sbr.rel (%p2026_p10) target bundleno = 110 (0x6e), region = 20 }
  0x15   : > { %161 = sbr.rel (!%p70_p4) target bundleno = 110 (0x6e), region = 24  ;;  %s163_s26 = sand.u32 (%p70_p4), 1, %s2545_s14  }
  0x16   : > { %s2028_s27 = sshll.u32 (%p70_p4), %s2553_s16, 2  ;;  %s2027_s28 = sshll.u32 (%p70_p4), %s163_s26, 9 }
  0x17   : > { %s2645_s4 = scalar_lea.vmem (%p70_p4), %s3508_s1, %s2028_s27  ;;  %s2649_s5 = scalar_lea.vmem (%p70_p4), [#allocation2], %s2027_s28 }
  0x18   : > { %v183_v0 = vld [vmem:[%s2645_s4] sm:$0xf] (%p70_p4)  ;;  %v185_v1 = vld [vmem:[%s2645_s4 + $0x8] sm:$0xf] (%p70_p4)  ;;  %v187_v2 = vld [vmem:[%s2645_s4 + $0x10] sm:$0xf] (%p70_p4) }
  0x19   : > { %184 = vst [vmem:[%s2649_s5] sm:$0xf] (%p70_p4), %v183_v0  ;;  %186 = vst [vmem:[%s2649_s5 + $0x4] sm:$0xf] (%p70_p4), %v185_v1  ;;  %v189_v3 = vld [vmem:[%s2645_s4 + $0x18] sm:$0xf] (%p70_p4) }
  0x1a   : > { %v191_v4 = vld [vmem:[%s2645_s4 + $0x20] sm:$0xf] (%p70_p4)  ;;  %188 = vst [vmem:[%s2649_s5 + $0x8] sm:$0xf] (%p70_p4), %v187_v2  ;;  %190 = vst [vmem:[%s2649_s5 + $0xc] sm:$0xf] (%p70_p4), %v189_v3 }
  0x1b   : > { %192 = vst [vmem:[%s2649_s5 + $0x10] sm:$0xf] (%p70_p4), %v191_v4  ;;  %v193_v5 = vld [vmem:[%s2645_s4 + $0x28] sm:$0xf] (%p70_p4)  ;;  %v195_v6 = vld [vmem:[%s2645_s4 + $0x30] sm:$0xf] (%p70_p4) }
  0x1c   : > { %v197_v7 = vld [vmem:[%s2645_s4 + $0x38] sm:$0xf]  ;;  %194 = vst [vmem:[%s2649_s5 + $0x14] sm:$0xf] %v193_v5  ;;  %196 = vst [vmem:[%s2649_s5 + $0x18] sm:$0xf] %v195_v6 }
  0x1d   : > { %198 = vst [vmem:[%s2649_s5 + $0x1c] sm:$0xf] %v197_v7  ;;  %v199_v8 = vld [vmem:[%s2645_s4 + $0x40] sm:$0xf]  ;;  %v201_v9 = vld [vmem:[%s2645_s4 + $0x48] sm:$0xf] }
  0x1e   : > { %v203_v10 = vld [vmem:[%s2645_s4 + $0x50] sm:$0xf]  ;;  %200 = vst [vmem:[%s2649_s5 + $0x20] sm:$0xf] %v199_v8  ;;  %202 = vst [vmem:[%s2649_s5 + $0x24] sm:$0xf] %v201_v9 }
  0x1f   : > { %204 = vst [vmem:[%s2649_s5 + $0x28] sm:$0xf] %v203_v10  ;;  %v205_v11 = vld [vmem:[%s2645_s4 + $0x58] sm:$0xf]  ;;  %v207_v12 = vld [vmem:[%s2645_s4 + $0x60] sm:$0xf] }
  0x20   : > { %v209_v13 = vld [vmem:[%s2645_s4 + $0x68] sm:$0xf]  ;;  %206 = vst [vmem:[%s2649_s5 + $0x2c] sm:$0xf] %v205_v11  ;;  %208 = vst [vmem:[%s2649_s5 + $0x30] sm:$0xf] %v207_v12 }
  0x21   : > { %210 = vst [vmem:[%s2649_s5 + $0x34] sm:$0xf] %v209_v13  ;;  %v211_v14 = vld [vmem:[%s2645_s4 + $0x70] sm:$0xf]  ;;  %v213_v15 = vld [vmem:[%s2645_s4 + $0x78] sm:$0xf] }
  0x22   : > { %v215_v16 = vld [vmem:[%s2645_s4 + $0x80] sm:$0xf]  ;;  %212 = vst [vmem:[%s2649_s5 + $0x38] sm:$0xf] %v211_v14  ;;  %214 = vst [vmem:[%s2649_s5 + $0x3c] sm:$0xf] %v213_v15 }
  0x23   : > { %216 = vst [vmem:[%s2649_s5 + $0x40] sm:$0xf] %v215_v16  ;;  %v217_v17 = vld [vmem:[%s2645_s4 + $0x88] sm:$0xf]  ;;  %v219_v18 = vld [vmem:[%s2645_s4 + $0x90] sm:$0xf] }
  0x24   : > { %v221_v19 = vld [vmem:[%s2645_s4 + $0x98] sm:$0xf]  ;;  %218 = vst [vmem:[%s2649_s5 + $0x44] sm:$0xf] %v217_v17  ;;  %220 = vst [vmem:[%s2649_s5 + $0x48] sm:$0xf] %v219_v18 }
  0x25   : > { %222 = vst [vmem:[%s2649_s5 + $0x4c] sm:$0xf] %v221_v19  ;;  %v223_v20 = vld [vmem:[%s2645_s4 + $0xa0] sm:$0xf]  ;;  %v225_v21 = vld [vmem:[%s2645_s4 + $0xa8] sm:$0xf] }
  0x26   : > { %v227_v22 = vld [vmem:[%s2645_s4 + $0xb0] sm:$0xf]  ;;  %224 = vst [vmem:[%s2649_s5 + $0x50] sm:$0xf] %v223_v20  ;;  %226 = vst [vmem:[%s2649_s5 + $0x54] sm:$0xf] %v225_v21 }
  0x27   : > { %228 = vst [vmem:[%s2649_s5 + $0x58] sm:$0xf] %v227_v22  ;;  %v229_v23 = vld [vmem:[%s2645_s4 + $0xb8] sm:$0xf]  ;;  %v231_v24 = vld [vmem:[%s2645_s4 + $0xc0] sm:$0xf] }
  0x28   : > { %v233_v25 = vld [vmem:[%s2645_s4 + $0xc8] sm:$0xf]  ;;  %230 = vst [vmem:[%s2649_s5 + $0x5c] sm:$0xf] %v229_v23  ;;  %232 = vst [vmem:[%s2649_s5 + $0x60] sm:$0xf] %v231_v24 }
  0x29   : > { %234 = vst [vmem:[%s2649_s5 + $0x64] sm:$0xf] %v233_v25  ;;  %v235_v26 = vld [vmem:[%s2645_s4 + $0xd0] sm:$0xf]  ;;  %v237_v27 = vld [vmem:[%s2645_s4 + $0xd8] sm:$0xf] }
  0x2a   : > { %v239_v28 = vld [vmem:[%s2645_s4 + $0xe0] sm:$0xf]  ;;  %236 = vst [vmem:[%s2649_s5 + $0x68] sm:$0xf] %v235_v26  ;;  %238 = vst [vmem:[%s2649_s5 + $0x6c] sm:$0xf] %v237_v27 }
  0x2b   : > { %240 = vst [vmem:[%s2649_s5 + $0x70] sm:$0xf] %v239_v28  ;;  %v241_v29 = vld [vmem:[%s2645_s4 + $0xe8] sm:$0xf]  ;;  %v243_v30 = vld [vmem:[%s2645_s4 + $0xf0] sm:$0xf] }
  0x2c   : > { %v245_v31 = vld [vmem:[%s2645_s4 + $0xf8] sm:$0xf]  ;;  %242 = vst [vmem:[%s2649_s5 + $0x74] sm:$0xf] %v241_v29  ;;  %244 = vst [vmem:[%s2649_s5 + $0x78] sm:$0xf] %v243_v30 }
  0x2d   : > { %246 = vst [vmem:[%s2649_s5 + $0x7c] sm:$0xf] %v245_v31  ;;  %v247_v32 = vld [vmem:[%s2645_s4 + $0x100] sm:$0xf]  ;;  %v249_v33 = vld [vmem:[%s2645_s4 + $0x108] sm:$0xf] }
  0x2e   : > { %v251_v34 = vld [vmem:[%s2645_s4 + $0x110] sm:$0xf]  ;;  %248 = vst [vmem:[%s2649_s5 + $0x80] sm:$0xf] %v247_v32  ;;  %250 = vst [vmem:[%s2649_s5 + $0x84] sm:$0xf] %v249_v33 }
  0x2f   : > { %252 = vst [vmem:[%s2649_s5 + $0x88] sm:$0xf] %v251_v34  ;;  %v253_v35 = vld [vmem:[%s2645_s4 + $0x118] sm:$0xf]  ;;  %v255_v36 = vld [vmem:[%s2645_s4 + $0x120] sm:$0xf] }
  0x30   : > { %v257_v37 = vld [vmem:[%s2645_s4 + $0x128] sm:$0xf]  ;;  %254 = vst [vmem:[%s2649_s5 + $0x8c] sm:$0xf] %v253_v35  ;;  %256 = vst [vmem:[%s2649_s5 + $0x90] sm:$0xf] %v255_v36 }
  0x31   : > { %258 = vst [vmem:[%s2649_s5 + $0x94] sm:$0xf] %v257_v37  ;;  %v259_v38 = vld [vmem:[%s2645_s4 + $0x130] sm:$0xf]  ;;  %v261_v39 = vld [vmem:[%s2645_s4 + $0x138] sm:$0xf] }
  0x32   : > { %v263_v40 = vld [vmem:[%s2645_s4 + $0x140] sm:$0xf]  ;;  %260 = vst [vmem:[%s2649_s5 + $0x98] sm:$0xf] %v259_v38  ;;  %262 = vst [vmem:[%s2649_s5 + $0x9c] sm:$0xf] %v261_v39 }
  0x33   : > { %264 = vst [vmem:[%s2649_s5 + $0xa0] sm:$0xf] %v263_v40  ;;  %v265_v41 = vld [vmem:[%s2645_s4 + $0x148] sm:$0xf]  ;;  %v267_v42 = vld [vmem:[%s2645_s4 + $0x150] sm:$0xf] }
  0x34   : > { %v269_v43 = vld [vmem:[%s2645_s4 + $0x158] sm:$0xf]  ;;  %266 = vst [vmem:[%s2649_s5 + $0xa4] sm:$0xf] %v265_v41  ;;  %268 = vst [vmem:[%s2649_s5 + $0xa8] sm:$0xf] %v267_v42 }
  0x35   : > { %270 = vst [vmem:[%s2649_s5 + $0xac] sm:$0xf] %v269_v43  ;;  %v271_v44 = vld [vmem:[%s2645_s4 + $0x160] sm:$0xf]  ;;  %v273_v45 = vld [vmem:[%s2645_s4 + $0x168] sm:$0xf] }
  0x36   : > { %v275_v46 = vld [vmem:[%s2645_s4 + $0x170] sm:$0xf]  ;;  %272 = vst [vmem:[%s2649_s5 + $0xb0] sm:$0xf] %v271_v44  ;;  %274 = vst [vmem:[%s2649_s5 + $0xb4] sm:$0xf] %v273_v45 }
  0x37   : > { %276 = vst [vmem:[%s2649_s5 + $0xb8] sm:$0xf] %v275_v46  ;;  %v277_v47 = vld [vmem:[%s2645_s4 + $0x178] sm:$0xf]  ;;  %v279_v48 = vld [vmem:[%s2645_s4 + $0x180] sm:$0xf] }
  0x38   : > { %v281_v49 = vld [vmem:[%s2645_s4 + $0x188] sm:$0xf]  ;;  %278 = vst [vmem:[%s2649_s5 + $0xbc] sm:$0xf] %v277_v47  ;;  %280 = vst [vmem:[%s2649_s5 + $0xc0] sm:$0xf] %v279_v48 }
  0x39   : > { %282 = vst [vmem:[%s2649_s5 + $0xc4] sm:$0xf] %v281_v49  ;;  %v283_v50 = vld [vmem:[%s2645_s4 + $0x190] sm:$0xf]  ;;  %v285_v51 = vld [vmem:[%s2645_s4 + $0x198] sm:$0xf] }
  0x3a   : > { %v287_v52 = vld [vmem:[%s2645_s4 + $0x1a0] sm:$0xf]  ;;  %284 = vst [vmem:[%s2649_s5 + $0xc8] sm:$0xf] %v283_v50  ;;  %286 = vst [vmem:[%s2649_s5 + $0xcc] sm:$0xf] %v285_v51 }
  0x3b   : > { %288 = vst [vmem:[%s2649_s5 + $0xd0] sm:$0xf] %v287_v52  ;;  %v289_v53 = vld [vmem:[%s2645_s4 + $0x1a8] sm:$0xf]  ;;  %v291_v54 = vld [vmem:[%s2645_s4 + $0x1b0] sm:$0xf] }
  0x3c   : > { %v293_v55 = vld [vmem:[%s2645_s4 + $0x1b8] sm:$0xf]  ;;  %290 = vst [vmem:[%s2649_s5 + $0xd4] sm:$0xf] %v289_v53  ;;  %292 = vst [vmem:[%s2649_s5 + $0xd8] sm:$0xf] %v291_v54 }
  0x3d   : > { %294 = vst [vmem:[%s2649_s5 + $0xdc] sm:$0xf] %v293_v55  ;;  %v295_v56 = vld [vmem:[%s2645_s4 + $0x1c0] sm:$0xf]  ;;  %v297_v57 = vld [vmem:[%s2645_s4 + $0x1c8] sm:$0xf] }
  0x3e   : > { %v299_v58 = vld [vmem:[%s2645_s4 + $0x1d0] sm:$0xf]  ;;  %296 = vst [vmem:[%s2649_s5 + $0xe0] sm:$0xf] %v295_v56  ;;  %298 = vst [vmem:[%s2649_s5 + $0xe4] sm:$0xf] %v297_v57 }
  0x3f   : > { %300 = vst [vmem:[%s2649_s5 + $0xe8] sm:$0xf] %v299_v58  ;;  %v301_v59 = vld [vmem:[%s2645_s4 + $0x1d8] sm:$0xf]  ;;  %v303_v60 = vld [vmem:[%s2645_s4 + $0x1e0] sm:$0xf] }
  0x40   : > { %v305_v61 = vld [vmem:[%s2645_s4 + $0x1e8] sm:$0xf]  ;;  %302 = vst [vmem:[%s2649_s5 + $0xec] sm:$0xf] %v301_v59  ;;  %304 = vst [vmem:[%s2649_s5 + $0xf0] sm:$0xf] %v303_v60 }
  0x41   : > { %306 = vst [vmem:[%s2649_s5 + $0xf4] sm:$0xf] %v305_v61  ;;  %v307_v62 = vld [vmem:[%s2645_s4 + $0x1f0] sm:$0xf]  ;;  %v309_v63 = vld [vmem:[%s2645_s4 + $0x1f8] sm:$0xf] }
  0x42   : > { %v311_v0 = vld [vmem:[%s2645_s4 + $0x200] sm:$0xf]  ;;  %308 = vst [vmem:[%s2649_s5 + $0xf8] sm:$0xf] %v307_v62  ;;  %310 = vst [vmem:[%s2649_s5 + $0xfc] sm:$0xf] %v309_v63 }
  0x43   : > { %312 = vst [vmem:[%s2649_s5 + $0x100] sm:$0xf] %v311_v0  ;;  %v313_v1 = vld [vmem:[%s2645_s4 + $0x208] sm:$0xf]  ;;  %v315_v2 = vld [vmem:[%s2645_s4 + $0x210] sm:$0xf] }
  0x44   : > { %v317_v3 = vld [vmem:[%s2645_s4 + $0x218] sm:$0xf]  ;;  %314 = vst [vmem:[%s2649_s5 + $0x104] sm:$0xf] %v313_v1  ;;  %316 = vst [vmem:[%s2649_s5 + $0x108] sm:$0xf] %v315_v2 }
  0x45   : > { %318 = vst [vmem:[%s2649_s5 + $0x10c] sm:$0xf] %v317_v3  ;;  %v319_v4 = vld [vmem:[%s2645_s4 + $0x220] sm:$0xf]  ;;  %v321_v5 = vld [vmem:[%s2645_s4 + $0x228] sm:$0xf] }
  0x46   : > { %v323_v6 = vld [vmem:[%s2645_s4 + $0x230] sm:$0xf]  ;;  %320 = vst [vmem:[%s2649_s5 + $0x110] sm:$0xf] %v319_v4  ;;  %322 = vst [vmem:[%s2649_s5 + $0x114] sm:$0xf] %v321_v5 }
  0x47   : > { %324 = vst [vmem:[%s2649_s5 + $0x118] sm:$0xf] %v323_v6  ;;  %v325_v7 = vld [vmem:[%s2645_s4 + $0x238] sm:$0xf]  ;;  %v327_v8 = vld [vmem:[%s2645_s4 + $0x240] sm:$0xf] }
  0x48   : > { %v329_v9 = vld [vmem:[%s2645_s4 + $0x248] sm:$0xf]  ;;  %326 = vst [vmem:[%s2649_s5 + $0x11c] sm:$0xf] %v325_v7  ;;  %328 = vst [vmem:[%s2649_s5 + $0x120] sm:$0xf] %v327_v8 }
  0x49   : > { %330 = vst [vmem:[%s2649_s5 + $0x124] sm:$0xf] %v329_v9  ;;  %v331_v10 = vld [vmem:[%s2645_s4 + $0x250] sm:$0xf]  ;;  %v333_v11 = vld [vmem:[%s2645_s4 + $0x258] sm:$0xf] }
  0x4a   : > { %v335_v12 = vld [vmem:[%s2645_s4 + $0x260] sm:$0xf]  ;;  %332 = vst [vmem:[%s2649_s5 + $0x128] sm:$0xf] %v331_v10  ;;  %334 = vst [vmem:[%s2649_s5 + $0x12c] sm:$0xf] %v333_v11 }
  0x4b   : > { %336 = vst [vmem:[%s2649_s5 + $0x130] sm:$0xf] %v335_v12  ;;  %v337_v13 = vld [vmem:[%s2645_s4 + $0x268] sm:$0xf]  ;;  %v339_v14 = vld [vmem:[%s2645_s4 + $0x270] sm:$0xf] }
  0x4c   : > { %v341_v15 = vld [vmem:[%s2645_s4 + $0x278] sm:$0xf]  ;;  %338 = vst [vmem:[%s2649_s5 + $0x134] sm:$0xf] %v337_v13  ;;  %340 = vst [vmem:[%s2649_s5 + $0x138] sm:$0xf] %v339_v14 }
  0x4d   : > { %342 = vst [vmem:[%s2649_s5 + $0x13c] sm:$0xf] %v341_v15  ;;  %v343_v16 = vld [vmem:[%s2645_s4 + $0x280] sm:$0xf]  ;;  %v345_v17 = vld [vmem:[%s2645_s4 + $0x288] sm:$0xf] }
  0x4e   : > { %v347_v18 = vld [vmem:[%s2645_s4 + $0x290] sm:$0xf]  ;;  %344 = vst [vmem:[%s2649_s5 + $0x140] sm:$0xf] %v343_v16  ;;  %346 = vst [vmem:[%s2649_s5 + $0x144] sm:$0xf] %v345_v17 }
  0x4f   : > { %348 = vst [vmem:[%s2649_s5 + $0x148] sm:$0xf] %v347_v18  ;;  %v349_v19 = vld [vmem:[%s2645_s4 + $0x298] sm:$0xf]  ;;  %v351_v20 = vld [vmem:[%s2645_s4 + $0x2a0] sm:$0xf] }
  0x50   : > { %v353_v21 = vld [vmem:[%s2645_s4 + $0x2a8] sm:$0xf]  ;;  %350 = vst [vmem:[%s2649_s5 + $0x14c] sm:$0xf] %v349_v19  ;;  %352 = vst [vmem:[%s2649_s5 + $0x150] sm:$0xf] %v351_v20 }
  0x51   : > { %354 = vst [vmem:[%s2649_s5 + $0x154] sm:$0xf] %v353_v21  ;;  %v355_v22 = vld [vmem:[%s2645_s4 + $0x2b0] sm:$0xf]  ;;  %v357_v23 = vld [vmem:[%s2645_s4 + $0x2b8] sm:$0xf] }
  0x52   : > { %v359_v24 = vld [vmem:[%s2645_s4 + $0x2c0] sm:$0xf]  ;;  %356 = vst [vmem:[%s2649_s5 + $0x158] sm:$0xf] %v355_v22  ;;  %358 = vst [vmem:[%s2649_s5 + $0x15c] sm:$0xf] %v357_v23 }
  0x53   : > { %360 = vst [vmem:[%s2649_s5 + $0x160] sm:$0xf] %v359_v24  ;;  %v361_v25 = vld [vmem:[%s2645_s4 + $0x2c8] sm:$0xf]  ;;  %v363_v26 = vld [vmem:[%s2645_s4 + $0x2d0] sm:$0xf] }
  0x54   : > { %v365_v27 = vld [vmem:[%s2645_s4 + $0x2d8] sm:$0xf]  ;;  %362 = vst [vmem:[%s2649_s5 + $0x164] sm:$0xf] %v361_v25  ;;  %364 = vst [vmem:[%s2649_s5 + $0x168] sm:$0xf] %v363_v26 }
  0x55   : > { %366 = vst [vmem:[%s2649_s5 + $0x16c] sm:$0xf] %v365_v27  ;;  %v367_v28 = vld [vmem:[%s2645_s4 + $0x2e0] sm:$0xf]  ;;  %v369_v29 = vld [vmem:[%s2645_s4 + $0x2e8] sm:$0xf] }
  0x56   : > { %v371_v30 = vld [vmem:[%s2645_s4 + $0x2f0] sm:$0xf]  ;;  %368 = vst [vmem:[%s2649_s5 + $0x170] sm:$0xf] %v367_v28  ;;  %370 = vst [vmem:[%s2649_s5 + $0x174] sm:$0xf] %v369_v29 }
  0x57   : > { %372 = vst [vmem:[%s2649_s5 + $0x178] sm:$0xf] %v371_v30  ;;  %v373_v31 = vld [vmem:[%s2645_s4 + $0x2f8] sm:$0xf]  ;;  %v375_v32 = vld [vmem:[%s2645_s4 + $0x300] sm:$0xf] }
  0x58   : > { %v377_v33 = vld [vmem:[%s2645_s4 + $0x308] sm:$0xf]  ;;  %374 = vst [vmem:[%s2649_s5 + $0x17c] sm:$0xf] %v373_v31  ;;  %376 = vst [vmem:[%s2649_s5 + $0x180] sm:$0xf] %v375_v32 }
  0x59   : > { %378 = vst [vmem:[%s2649_s5 + $0x184] sm:$0xf] %v377_v33  ;;  %v379_v34 = vld [vmem:[%s2645_s4 + $0x310] sm:$0xf]  ;;  %v381_v35 = vld [vmem:[%s2645_s4 + $0x318] sm:$0xf] }
  0x5a   : > { %v383_v36 = vld [vmem:[%s2645_s4 + $0x320] sm:$0xf]  ;;  %380 = vst [vmem:[%s2649_s5 + $0x188] sm:$0xf] %v379_v34  ;;  %382 = vst [vmem:[%s2649_s5 + $0x18c] sm:$0xf] %v381_v35 }
  0x5b   : > { %384 = vst [vmem:[%s2649_s5 + $0x190] sm:$0xf] %v383_v36  ;;  %v385_v37 = vld [vmem:[%s2645_s4 + $0x328] sm:$0xf]  ;;  %v387_v38 = vld [vmem:[%s2645_s4 + $0x330] sm:$0xf] }
  0x5c   : > { %v389_v39 = vld [vmem:[%s2645_s4 + $0x338] sm:$0xf]  ;;  %386 = vst [vmem:[%s2649_s5 + $0x194] sm:$0xf] %v385_v37  ;;  %388 = vst [vmem:[%s2649_s5 + $0x198] sm:$0xf] %v387_v38 }
  0x5d   : > { %390 = vst [vmem:[%s2649_s5 + $0x19c] sm:$0xf] %v389_v39  ;;  %v391_v40 = vld [vmem:[%s2645_s4 + $0x340] sm:$0xf]  ;;  %v393_v41 = vld [vmem:[%s2645_s4 + $0x348] sm:$0xf] }
  0x5e   : > { %v395_v42 = vld [vmem:[%s2645_s4 + $0x350] sm:$0xf]  ;;  %392 = vst [vmem:[%s2649_s5 + $0x1a0] sm:$0xf] %v391_v40  ;;  %394 = vst [vmem:[%s2649_s5 + $0x1a4] sm:$0xf] %v393_v41 }
  0x5f   : > { %396 = vst [vmem:[%s2649_s5 + $0x1a8] sm:$0xf] %v395_v42  ;;  %v397_v43 = vld [vmem:[%s2645_s4 + $0x358] sm:$0xf]  ;;  %v399_v44 = vld [vmem:[%s2645_s4 + $0x360] sm:$0xf] }
  0x60   : > { %v401_v45 = vld [vmem:[%s2645_s4 + $0x368] sm:$0xf]  ;;  %398 = vst [vmem:[%s2649_s5 + $0x1ac] sm:$0xf] %v397_v43  ;;  %400 = vst [vmem:[%s2649_s5 + $0x1b0] sm:$0xf] %v399_v44 }
  0x61   : > { %402 = vst [vmem:[%s2649_s5 + $0x1b4] sm:$0xf] %v401_v45  ;;  %v403_v46 = vld [vmem:[%s2645_s4 + $0x370] sm:$0xf]  ;;  %v405_v47 = vld [vmem:[%s2645_s4 + $0x378] sm:$0xf] }
  0x62   : > { %v407_v48 = vld [vmem:[%s2645_s4 + $0x380] sm:$0xf]  ;;  %404 = vst [vmem:[%s2649_s5 + $0x1b8] sm:$0xf] %v403_v46  ;;  %406 = vst [vmem:[%s2649_s5 + $0x1bc] sm:$0xf] %v405_v47 }
  0x63   : > { %408 = vst [vmem:[%s2649_s5 + $0x1c0] sm:$0xf] %v407_v48  ;;  %v409_v49 = vld [vmem:[%s2645_s4 + $0x388] sm:$0xf]  ;;  %v411_v50 = vld [vmem:[%s2645_s4 + $0x390] sm:$0xf] }
  0x64   : > { %v413_v51 = vld [vmem:[%s2645_s4 + $0x398] sm:$0xf]  ;;  %410 = vst [vmem:[%s2649_s5 + $0x1c4] sm:$0xf] %v409_v49  ;;  %412 = vst [vmem:[%s2649_s5 + $0x1c8] sm:$0xf] %v411_v50 }
  0x65   : > { %414 = vst [vmem:[%s2649_s5 + $0x1cc] sm:$0xf] %v413_v51  ;;  %v415_v52 = vld [vmem:[%s2645_s4 + $0x3a0] sm:$0xf]  ;;  %v417_v53 = vld [vmem:[%s2645_s4 + $0x3a8] sm:$0xf] }
  0x66   : > { %v419_v54 = vld [vmem:[%s2645_s4 + $0x3b0] sm:$0xf]  ;;  %416 = vst [vmem:[%s2649_s5 + $0x1d0] sm:$0xf] %v415_v52  ;;  %418 = vst [vmem:[%s2649_s5 + $0x1d4] sm:$0xf] %v417_v53 }
  0x67   : > { %420 = vst [vmem:[%s2649_s5 + $0x1d8] sm:$0xf] %v419_v54  ;;  %v421_v55 = vld [vmem:[%s2645_s4 + $0x3b8] sm:$0xf]  ;;  %v423_v56 = vld [vmem:[%s2645_s4 + $0x3c0] sm:$0xf] }
  0x68   : > { %v425_v57 = vld [vmem:[%s2645_s4 + $0x3c8] sm:$0xf]  ;;  %422 = vst [vmem:[%s2649_s5 + $0x1dc] sm:$0xf] %v421_v55  ;;  %424 = vst [vmem:[%s2649_s5 + $0x1e0] sm:$0xf] %v423_v56 }
  0x69   : > { %426 = vst [vmem:[%s2649_s5 + $0x1e4] sm:$0xf] %v425_v57  ;;  %v427_v58 = vld [vmem:[%s2645_s4 + $0x3d0] sm:$0xf]  ;;  %v429_v59 = vld [vmem:[%s2645_s4 + $0x3d8] sm:$0xf] }
  0x6a   : > { %v431_v60 = vld [vmem:[%s2645_s4 + $0x3e0] sm:$0xf]  ;;  %428 = vst [vmem:[%s2649_s5 + $0x1e8] sm:$0xf] %v427_v58  ;;  %430 = vst [vmem:[%s2649_s5 + $0x1ec] sm:$0xf] %v429_v59 }
  0x6b   : > { %432 = vst [vmem:[%s2649_s5 + $0x1f0] sm:$0xf] %v431_v60  ;;  %v433_v61 = vld [vmem:[%s2645_s4 + $0x3e8] sm:$0xf]  ;;  %v435_v62 = vld [vmem:[%s2645_s4 + $0x3f0] sm:$0xf] }
  0x6c   : > { %v437_v63 = vld [vmem:[%s2645_s4 + $0x3f8] sm:$0xf]  ;;  %434 = vst [vmem:[%s2649_s5 + $0x1f4] sm:$0xf] %v433_v61  ;;  %436 = vst [vmem:[%s2649_s5 + $0x1f8] sm:$0xf] %v435_v62 }
  0x6d   : > { %438 = vst [vmem:[%s2649_s5 + $0x1fc] sm:$0xf] %v437_v63 }
  0x6e PF: > { %p2029_p11 = scmp.ge.s32.totalorder %s2557_s17, 1  ;;  %p722_p12 = scmp.lt.s32.totalorder %s2557_s17, 3 }
  0x70   : > { %p723_p13 = pnand %p2029_p11, %p722_p12 }
  0x71   : > { %s2908_s6 = sand.u32 (!%p723_p13), 1, %s2541_s13   ;;  %v774_v0 = vld [vmem:[%s3507_s0 + $0x8] sm:$0xff] (!%p723_p13)  ;;  %v776_v2 = vld [vmem:[%s3507_s0 + $0x18] sm:$0xff] (!%p723_p13)  ;;  %v773_v33 = vld [vmem:[%s3507_s0] sm:$0xff] (!%p723_p13)  ;;  %p768_p0 = scmp.lt.s32.totalorder (!%p723_p13), %s2549_s15, 1 }
  0x72   : > { %726 = sbr.rel (%p723_p13) target bundleno = 509 (0x1fd), region = 69  ;;  %v782_v1 = vld [vmem:[%s3507_s0 + $0x48] sm:$0xff] (!%p723_p13)  ;;  %s2030_s19 = sshll.u32 (!%p723_p13), %s2908_s6, 9  ;;  %v784_v4 = vld [vmem:[%s3507_s0 + $0x58] sm:$0xff] (!%p723_p13)  ;;  %v781_v34 = vld [vmem:[%s3507_s0 + $0x40] sm:$0xff] (!%p723_p13) }
  0x73   : > { %v902_v3 = vpack.c.bf16 (!%p723_p13), %v782_v1, %v774_v0  ;;  %v904_v5 = vpack.c.bf16 (!%p723_p13), %v784_v4, %v776_v2  ;;  %s2923_s26 = scalar_lea.vmem (!%p723_p13), [#allocation2], %s2030_s19  ;;  %v775_v36 = vld [vmem:[%s3507_s0 + $0x10] sm:$0xff] (!%p723_p13)  ;;  %v901_v42 = vpack.c.bf16 (!%p723_p13), %v781_v34, %v773_v33  ;;  %v790_v45 = vld [vmem:[%s3507_s0 + $0x88] sm:$0xff] (!%p723_p13)  ;;  %v792_v50 = vld [vmem:[%s3507_s0 + $0x98] sm:$0xff] (!%p723_p13)  ;;  %s2031_s30 = sshll.u32 (!%p723_p13), %s2908_s6, 7 }
  0x74   : > { %v2415_v6 = vld [vmem:[%s2923_s26 + $0x40] sm:$0xff] (!%p723_p13)   ;;  %v2419_v10 = vld [vmem:[%s2923_s26 + $0x48] sm:$0xff] (!%p723_p13)   ;;  %v2423_v14 = vld [vmem:[%s2923_s26 + $0x50] sm:$0xff] (!%p723_p13)   ;;  %s3419_s4 = scalar_lea.vmem (!%p723_p13), [#allocation3], %s2031_s30  ;;  %s2098_s5 = sshll.u32 (!%p723_p13), %s2549_s15, 7 }
  0x75   : > { %1516 = vmatprep.mubr.bf16.mxu0 (!%p723_p13), %v902_v3  ;;  %v2416_v7 = vld [vmem:[%s2923_s26 + $0xc0] sm:$0xff] (!%p723_p13)   ;;  %1613 = vmatprep.mubr.bf16.mxu1 (!%p723_p13), %v904_v5  ;;  %v2420_v11 = vld [vmem:[%s2923_s26 + $0xc8] sm:$0xff] (!%p723_p13)   ;;  %v2424_v15 = vld [vmem:[%s2923_s26 + $0xd0] sm:$0xff] (!%p723_p13)   ;;  %s1920_s7 = sshll.u32 (!%p723_p13), %s3419_s4, 4  ;;  %s3454_s10 = scalar_lea.hbm (!%p723_p13), %s3510_s3, %s2098_s5  ;;  %s3456_s7 = int_to_ptr.vmem [resolvable:$true] %s1920_s7 }
  0x76   : > { %2101 = vmatprep.subr.bf16.mxu0 (!%p723_p13), %v2415_v6  ;;  %v2417_v8 = vld [vmem:[%s2923_s26] sm:$0xff] (!%p723_p13)   ;;  %2165 = vmatprep.subr.bf16.mxu1 (!%p723_p13), %v2416_v7  ;;  %v2421_v12 = vld [vmem:[%s2923_s26 + $0x8] sm:$0xff] (!%p723_p13)   ;;  %v2425_v16 = vld [vmem:[%s2923_s26 + $0x10] sm:$0xff] (!%p723_p13)   ;;  %s2479_s11 = scalar_lea.vmem (!%p723_p13), %s3456_s7, 2048  ;;  %s2559_s18 = smov (!%p723_p13), [#allocation3]  }
  0x77   : > { %v2418_v9 = vld [vmem:[%s2923_s26 + $0x80] sm:$0xff] (!%p723_p13)   ;;  %2102 = vmatpush3.bf16.msra.mxu0 (!%p723_p13), %v2417_v8  ;;  %v2422_v13 = vld [vmem:[%s2923_s26 + $0x88] sm:$0xff] (!%p723_p13)   ;;  %v2426_v17 = vld [vmem:[%s2923_s26 + $0x90] sm:$0xff] (!%p723_p13)   ;;  %p2480_p1 = scmp.ne.s32.totalorder (!%p723_p13), %s3456_s7, %s2479_s11  ;;  %s2483_s19 = sshll.u32 (!%p723_p13), %s2559_s18, 4  ;;  %s2484_s19 = int_to_ptr.vmem [resolvable:$false] %s2483_s19 }
  0x78   : > { %2166 = vmatpush3.bf16.msra.mxu1 (!%p723_p13), %v2418_v9  ;;  %2103 = vmatprep.subr.bf16.mxu0 (!%p723_p13), %v2419_v10  ;;  %v2427_v18 = vld [vmem:[%s2923_s26 + $0x58] sm:$0xff] (!%p723_p13)   ;;  %v2431_v22 = vld [vmem:[%s2923_s26 + $0x60] sm:$0xff] (!%p723_p13)   ;;  %v2435_v26 = vld [vmem:[%s2923_s26 + $0x68] sm:$0xff] (!%p723_p13)   ;;  %s2485_s21 = scalar_lea.vmem (!%p723_p13), %s2484_s19, 4096  ;;  %p2486_p4 = scmp.lt.s32.totalorder (!%p723_p13), %s3456_s7, %s2484_s19 }
  0x79   : > { %2167 = vmatprep.subr.bf16.mxu1 %v2420_v11  ;;  %v2428_v19 = vld [vmem:[%s2923_s26 + $0xd8] sm:$0xff]   ;;  %v2432_v23 = vld [vmem:[%s2923_s26 + $0xe0] sm:$0xff]   ;;  %v2436_v27 = vld [vmem:[%s2923_s26 + $0xe8] sm:$0xff]   ;;  %p2481_p2 = pnand %p2480_p1, %p2622_p5  ;;  %p2487_p6 = scmp.lt.s32.totalorder %s2485_s21, %s2479_s11 }
  0x7a   : > { %v2429_v20 = vld [vmem:[%s2923_s26 + $0x18] sm:$0xff]   ;;  %v2433_v24 = vld [vmem:[%s2923_s26 + $0x20] sm:$0xff]   ;;  %v2437_v28 = vld [vmem:[%s2923_s26 + $0x28] sm:$0xff]  }
  0x7b   : > { %2104 = vmatpush3.bf16.msra.mxu0 %v2421_v12  ;;  %v2430_v21 = vld [vmem:[%s2923_s26 + $0x98] sm:$0xff]   ;;  %v2434_v25 = vld [vmem:[%s2923_s26 + $0xa0] sm:$0xff]   ;;  %v2438_v29 = vld [vmem:[%s2923_s26 + $0xa8] sm:$0xff]   ;;  %p2482_p3 = pneg %p2481_p2  ;;  %p2488_p7 = por %p2487_p6, %p2486_p4 }
  0x7c   : > { %2168 = vmatpush3.bf16.msra.mxu1 %v2422_v13  ;;  %2105 = vmatprep.subr.bf16.mxu0 %v2423_v14  ;;  %v2439_v30 = vld [vmem:[%s2923_s26 + $0x70] sm:$0xff]   ;;  %v2443_v38 = vld [vmem:[%s2923_s26 + $0x78] sm:$0xff]   ;;  %v2447_v44 = vld [vmem:[%s2923_s26 + $0x140] sm:$0xff]  }
  0x7d   : > { %2169 = vmatprep.subr.bf16.mxu1 %v2424_v15  ;;  %v2440_v31 = vld [vmem:[%s2923_s26 + $0xf0] sm:$0xff]   ;;  %v2444_v39 = vld [vmem:[%s2923_s26 + $0xf8] sm:$0xff]   ;;  %v2448_v46 = vld [vmem:[%s2923_s26 + $0x100] sm:$0xff]   ;;  %p2489_p8 = pnand %p2488_p7, %p2482_p3 }
  0x7e   : > { %v2441_v32 = vld [vmem:[%s2923_s26 + $0x30] sm:$0xff]   ;;  %v2445_v40 = vld [vmem:[%s2923_s26 + $0x38] sm:$0xff]   ;;  %v2449_v47 = vld [vmem:[%s2923_s26 + $0x1c0] sm:$0xff]  }
  0x7f   : > { %2106 = vmatpush3.bf16.msra.mxu0 %v2425_v16  ;;  %v2442_v35 = vld [vmem:[%s2923_s26 + $0xb0] sm:$0xff]   ;;  %v2446_v41 = vld [vmem:[%s2923_s26 + $0xb8] sm:$0xff]   ;;  %v2450_v48 = vld [vmem:[%s2923_s26 + $0x180] sm:$0xff]  }
  0x80   : > { %2170 = vmatpush3.bf16.msra.mxu1 %v2426_v17  ;;  %2107 = vmatprep.subr.bf16.mxu0 %v2427_v18  ;;  %v783_v37 = vld [vmem:[%s3507_s0 + $0x50] sm:$0xff]  ;;  %v798_v49 = vld [vmem:[%s3507_s0 + $0xc8] sm:$0xff]  ;;  %v800_v51 = vld [vmem:[%s3507_s0 + $0xd8] sm:$0xff] }
  0x81   : > { %2171 = vmatprep.subr.bf16.mxu1 %v2428_v19  ;;  %v903_v43 = vpack.c.bf16 %v783_v37, %v775_v36  ;;  %v910_v52 = vpack.c.bf16 %v798_v49, %v790_v45  ;;  %v912_v53 = vpack.c.bf16 %v800_v51, %v792_v50  ;;  %v789_v54 = vld [vmem:[%s3507_s0 + $0x80] sm:$0xff]  ;;  %v791_v56 = vld [vmem:[%s3507_s0 + $0x90] sm:$0xff]  ;;  %v2451_v59 = vld [vmem:[%s2923_s26 + $0x148] sm:$0xff]  }
  0x82   : > { %v797_v55 = vld [vmem:[%s3507_s0 + $0xc0] sm:$0xff]  ;;  %v799_v57 = vld [vmem:[%s3507_s0 + $0xd0] sm:$0xff]  ;;  %v2452_v61 = vld [vmem:[%s2923_s26 + $0x108] sm:$0xff]  }
  0x83   : > { %2108 = vmatpush3.bf16.msra.mxu0 %v2429_v20  ;;  %v909_v58 = vpack.c.bf16 %v797_v55, %v789_v54  ;;  %v911_v60 = vpack.c.bf16 %v799_v57, %v791_v56  ;;  %v2453_v62 = vld [vmem:[%s2923_s26 + $0x1c8] sm:$0xff]   ;;  %v808_v3 = vld [vmem:[%s3507_s0 + $0x118] sm:$0xff]  ;;  %v805_v5 = vld [vmem:[%s3507_s0 + $0x100] sm:$0xff] }
  0x84   : > { %2172 = vmatpush3.bf16.msra.mxu1 %v2430_v21  ;;  %2109 = vmatprep.subr.bf16.mxu0 %v2431_v22  ;;  %v2454_v63 = vld [vmem:[%s2923_s26 + $0x188] sm:$0xff]   ;;  %v816_v4 = vld [vmem:[%s3507_s0 + $0x158] sm:$0xff]  ;;  %v813_v7 = vld [vmem:[%s3507_s0 + $0x140] sm:$0xff] }
  0x85   : > { %2173 = vmatprep.subr.bf16.mxu1 %v2432_v23  ;;  %v806_v0 = vld [vmem:[%s3507_s0 + $0x108] sm:$0xff]  ;;  %v920_v6 = vpack.c.bf16 %v816_v4, %v808_v3  ;;  %v807_v8 = vld [vmem:[%s3507_s0 + $0x110] sm:$0xff]  ;;  %v917_v12 = vpack.c.bf16 %v813_v7, %v805_v5  ;;  %v824_v18 = vld [vmem:[%s3507_s0 + $0x198] sm:$0xff] }
  0x86   : > { %v814_v1 = vld [vmem:[%s3507_s0 + $0x148] sm:$0xff]  ;;  %v815_v9 = vld [vmem:[%s3507_s0 + $0x150] sm:$0xff]  ;;  %v832_v20 = vld [vmem:[%s3507_s0 + $0x1d8] sm:$0xff] }
  0x87   : > { %2110 = vmatpush3.bf16.msra.mxu0 %v2433_v24  ;;  %v918_v2 = vpack.c.bf16 %v814_v1, %v806_v0  ;;  %v2455_v10 = vld [vmem:[%s2923_s26 + $0x150] sm:$0xff]   ;;  %v919_v14 = vpack.c.bf16 %v815_v9, %v807_v8  ;;  %v822_v16 = vld [vmem:[%s3507_s0 + $0x188] sm:$0xff]  ;;  %v821_v21 = vld [vmem:[%s3507_s0 + $0x180] sm:$0xff]  ;;  %v928_v23 = vpack.c.bf16 %v832_v20, %v824_v18 }
  0x88   : > { %2174 = vmatpush3.bf16.msra.mxu1 %v2434_v25  ;;  %2111 = vmatprep.subr.bf16.mxu0 %v2435_v26  ;;  %v2456_v11 = vld [vmem:[%s2923_s26 + $0x110] sm:$0xff]   ;;  %v830_v17 = vld [vmem:[%s3507_s0 + $0x1c8] sm:$0xff]  ;;  %v829_v22 = vld [vmem:[%s3507_s0 + $0x1c0] sm:$0xff] }
  0x89   : > { %2175 = vmatprep.subr.bf16.mxu1 %v2436_v27  ;;  %v2457_v13 = vld [vmem:[%s2923_s26 + $0x1d0] sm:$0xff]   ;;  %v926_v19 = vpack.c.bf16 %v830_v17, %v822_v16  ;;  %v2459_v26 = vld [vmem:[%s2923_s26 + $0x158] sm:$0xff]   ;;  %v846_v33 = vld [vmem:[%s3507_s0 + $0x248] sm:$0xff] }
  0x8a   : > { %v2458_v15 = vld [vmem:[%s2923_s26 + $0x190] sm:$0xff]   ;;  %v2460_v27 = vld [vmem:[%s2923_s26 + $0x118] sm:$0xff]   ;;  %v2466_v45 = vld [vmem:[%s2923_s26 + $0x1a0] sm:$0xff]  }
  0x8b   : > { %2112 = vmatpush3.bf16.msra.mxu0 %v2437_v28  ;;  %v823_v24 = vld [vmem:[%s3507_s0 + $0x190] sm:$0xff]  ;;  %v2461_v28 = vld [vmem:[%s2923_s26 + $0x1d8] sm:$0xff]   ;;  %v2467_v54 = vld [vmem:[%s2923_s26 + $0x168] sm:$0xff]  }
  0x8c   : > { %2176 = vmatpush3.bf16.msra.mxu1 %v2438_v29  ;;  %2113 = vmatprep.subr.bf16.mxu0 %v2439_v30  ;;  %v831_v25 = vld [vmem:[%s3507_s0 + $0x1d0] sm:$0xff]  ;;  %v925_v29 = vpack.c.bf16 %v829_v22, %v821_v21  ;;  %v2462_v30 = vld [vmem:[%s2923_s26 + $0x198] sm:$0xff]   ;;  %v853_v55 = vld [vmem:[%s3507_s0 + $0x280] sm:$0xff] }
  0x8d   : > { %2177 = vmatprep.subr.bf16.mxu1 %v2440_v31  ;;  %v838_v31 = vld [vmem:[%s3507_s0 + $0x208] sm:$0xff]  ;;  %v840_v34 = vld [vmem:[%s3507_s0 + $0x218] sm:$0xff]  ;;  %v861_v56 = vld [vmem:[%s3507_s0 + $0x2c0] sm:$0xff] }
  0x8e   : > { %v934_v36 = vpack.c.bf16 %v846_v33, %v838_v31  ;;  %v856_v49 = vld [vmem:[%s3507_s0 + $0x298] sm:$0xff]  ;;  %v2468_v57 = vld [vmem:[%s2923_s26 + $0x128] sm:$0xff]   ;;  %v2471_v5 = vld [vmem:[%s2923_s26 + $0x170] sm:$0xff]  }
  0x8f   : > { %2114 = vmatpush3.bf16.msra.mxu0 %v2441_v32  ;;  %v927_v32 = vpack.c.bf16 %v831_v25, %v823_v24  ;;  %v864_v50 = vld [vmem:[%s3507_s0 + $0x2d8] sm:$0xff]  ;;  %v2472_v7 = vld [vmem:[%s2923_s26 + $0x130] sm:$0xff]   ;;  %v869_v9 = vld [vmem:[%s3507_s0 + $0x300] sm:$0xff] }
  0x90   : > { %2178 = vmatpush3.bf16.msra.mxu1 %v2442_v35  ;;  %2115 = vmatprep.subr.bf16.mxu0 %v2443_v38  ;;  %v848_v35 = vld [vmem:[%s3507_s0 + $0x258] sm:$0xff]  ;;  %v837_v38 = vld [vmem:[%s3507_s0 + $0x200] sm:$0xff]  ;;  %v2473_v8 = vld [vmem:[%s2923_s26 + $0x1f0] sm:$0xff]  }
  0x91   : > { %2179 = vmatprep.subr.bf16.mxu1 %v2444_v39  ;;  %v936_v37 = vpack.c.bf16 %v848_v35, %v840_v34  ;;  %v845_v39 = vld [vmem:[%s3507_s0 + $0x240] sm:$0xff]  ;;  %v872_v0 = vld [vmem:[%s3507_s0 + $0x318] sm:$0xff]  ;;  %v786_v31 = vld [vmem:[%s3507_s0 + $0x68] sm:$0xff] }
  0x92   : > { %v880_v1 = vld [vmem:[%s3507_s0 + $0x358] sm:$0xff] }
  0x93   : > { %2116 = vmatpush3.bf16.msra.mxu0 %v2445_v40  ;;  %v839_v40 = vld [vmem:[%s3507_s0 + $0x210] sm:$0xff]  ;;  %v888_v16 = vld [vmem:[%s3507_s0 + $0x398] sm:$0xff] }
  0x94   : > { %2180 = vmatpush3.bf16.msra.mxu1 %v2446_v41  ;;  %2229 = vmatprep.subr.bf16.mxu0 %v2447_v44  ;;  %v847_v41 = vld [vmem:[%s3507_s0 + $0x250] sm:$0xff]  ;;  %v2465_v44 = vld [vmem:[%s2923_s26 + $0x1e0] sm:$0xff]   ;;  %v896_v17 = vld [vmem:[%s3507_s0 + $0x3d8] sm:$0xff] }
  0x95   : > { %2293 = vmatprep.subr.bf16.mxu1 %v2449_v47  ;;  %v862_v47 = vld [vmem:[%s3507_s0 + $0x2c8] sm:$0xff]  ;;  %v935_v51 = vpack.c.bf16 %v847_v41, %v839_v40  ;;  %v2476_v22 = vld [vmem:[%s2923_s26 + $0x138] sm:$0xff]   ;;  %v779_v40 = vld [vmem:[%s3507_s0 + $0x30] sm:$0xff] }
  0x96   : > { %1517 = vmatmul.mubr.bf16.vlgmr.msra.gmra.mrb[0].mxu0 %v901_v42  ;;  %v2463_v42 = vld [vmem:[%s2923_s26 + $0x160] sm:$0xff]   ;;  %v2477_v24 = vld [vmem:[%s2923_s26 + $0x1f8] sm:$0xff]   ;;  %v787_v41 = vld [vmem:[%s3507_s0 + $0x70] sm:$0xff] }
  0x97   : > { %1614 = vmatmul.mubr.bf16.vlgmr.msra.gmra.mrb[0].mxu1 %v903_v43  ;;  %2230 = vmatpush3.bf16.msra.mxu0 %v2448_v46  ;;  %v2464_v43 = vld [vmem:[%s2923_s26 + $0x120] sm:$0xff]   ;;  %v854_v46 = vld [vmem:[%s3507_s0 + $0x288] sm:$0xff]  ;;  %v2478_v25 = vld [vmem:[%s2923_s26 + $0x1b8] sm:$0xff]  }
  0x98   : > { %2294 = vmatpush3.bf16.msra.mxu1 %v2450_v48  ;;  %1524 = vmatprep.mubr.bf16.mxu0 %v910_v52  ;;  %v933_v48 = vpack.c.bf16 %v845_v39, %v837_v38  ;;  %v942_v52 = vpack.c.bf16 %v862_v47, %v854_v46  ;;  %v788_v33 = vld [vmem:[%s3507_s0 + $0x78] sm:$0xff]  ;;  %v777_v38 = vld [vmem:[%s3507_s0 + $0x20] sm:$0xff]  ;;  %v907_v47 = vpack.c.bf16 %v787_v41, %v779_v40 }
  0x99   : > { %1621 = vmatprep.mubr.bf16.mxu1 %v912_v53  ;;  %2231 = vmatprep.subr.bf16.mxu0 %v2451_v59  ;;  %v944_v53 = vpack.c.bf16 %v864_v50, %v856_v49  ;;  %v2469_v59 = vld [vmem:[%s2923_s26 + $0x1e8] sm:$0xff]   ;;  %v785_v39 = vld [vmem:[%s3507_s0 + $0x60] sm:$0xff]  ;;  %v876_v40 = vld [vmem:[%s3507_s0 + $0x338] sm:$0xff] }
  0x9a   : > { %2295 = vmatprep.subr.bf16.mxu1 %v2453_v62  ;;  %v870_v62 = vld [vmem:[%s3507_s0 + $0x308] sm:$0xff]  ;;  %v905_v46 = vpack.c.bf16 %v785_v39, %v777_v38  ;;  %v793_v50 = vld [vmem:[%s3507_s0 + $0xa0] sm:$0xff]  ;;  %v884_v41 = vld [vmem:[%s3507_s0 + $0x378] sm:$0xff] }
  0x9b   : > { %2232 = vmatpush3.bf16.msra.mxu0 %v2452_v61  ;;  %v863_v61 = vld [vmem:[%s3507_s0 + $0x2d0] sm:$0xff]  ;;  %v874_v38 = vld [vmem:[%s3507_s0 + $0x328] sm:$0xff] }
  0x9c   : > { %2296 = vmatpush3.bf16.msra.mxu1 %v2454_v63  ;;  %2233 = vmatprep.subr.bf16.mxu0 %v2455_v10  ;;  %v878_v63 = vld [vmem:[%s3507_s0 + $0x348] sm:$0xff]  ;;  %v2474_v10 = vld [vmem:[%s2923_s26 + $0x1b0] sm:$0xff]  }
  0x9d   : > { %2297 = vmatprep.subr.bf16.mxu1 %v2457_v13  ;;  %v950_v4 = vpack.c.bf16 %v878_v63, %v870_v62  ;;  %v879_v13 = vld [vmem:[%s3507_s0 + $0x350] sm:$0xff]  ;;  %v809_v62 = vld [vmem:[%s3507_s0 + $0x120] sm:$0xff]  ;;  %v882_v39 = vld [vmem:[%s3507_s0 + $0x368] sm:$0xff] }
  0x9e   : > { %1525 = vmatmul.mubr.bf16.gmra.mrb[4].mxu0 %v909_v58  ;;  %v855_v58 = vld [vmem:[%s3507_s0 + $0x290] sm:$0xff]  ;;  %v817_v63 = vld [vmem:[%s3507_s0 + $0x160] sm:$0xff] }
  0x9f   : > { %1622 = vmatmul.mubr.bf16.gmra.mrb[4].mxu1 %v911_v60  ;;  %1532 = vmatprep.mubr.bf16.mxu0 %v918_v2  ;;  %v2470_v60 = vld [vmem:[%s2923_s26 + $0x1a8] sm:$0xff]   ;;  %v941_v2 = vpack.c.bf16 %v861_v56, %v853_v55  ;;  %v943_v3 = vpack.c.bf16 %v863_v61, %v855_v58  ;;  %v812_v56 = vld [vmem:[%s3507_s0 + $0x138] sm:$0xff] }
  0xa0   : > { %1629 = vmatprep.mubr.bf16.mxu1 %v920_v6  ;;  %2234 = vmatpush3.bf16.msra.mxu0 %v2456_v11  ;;  %v952_v6 = vpack.c.bf16 %v880_v1, %v872_v0  ;;  %v877_v11 = vld [vmem:[%s3507_s0 + $0x340] sm:$0xff]  ;;  %v818_v55 = vld [vmem:[%s3507_s0 + $0x168] sm:$0xff]  ;;  %v811_v0 = vld [vmem:[%s3507_s0 + $0x130] sm:$0xff] }
  0xa1   : > { %2298 = vmatpush3.bf16.msra.mxu1 %v2458_v15  ;;  %2235 = vmatprep.subr.bf16.mxu0 %v2459_v26  ;;  %v894_v15 = vld [vmem:[%s3507_s0 + $0x3c8] sm:$0xff]  ;;  %v949_v18 = vpack.c.bf16 %v877_v11, %v869_v9  ;;  %v885_v26 = vld [vmem:[%s3507_s0 + $0x380] sm:$0xff]  ;;  %v819_v1 = vld [vmem:[%s3507_s0 + $0x170] sm:$0xff] }
  0xa2   : > { %2299 = vmatprep.subr.bf16.mxu1 %v2461_v28  ;;  %v887_v28 = vld [vmem:[%s3507_s0 + $0x390] sm:$0xff]  ;;  %v833_v11 = vld [vmem:[%s3507_s0 + $0x1e0] sm:$0xff] }
  0xa4   : > { %2236 = vmatpush3.bf16.msra.mxu0 %v2460_v27  ;;  %v893_v27 = vld [vmem:[%s3507_s0 + $0x3c0] sm:$0xff] }
  0xa5   : > { %2300 = vmatpush3.bf16.msra.mxu1 %v2462_v30  ;;  %2237 = vmatprep.subr.bf16.mxu0 %v2463_v42  ;;  %v778_v30 = vld [vmem:[%s3507_s0 + $0x28] sm:$0xff]  ;;  %v957_v34 = vpack.c.bf16 %v893_v27, %v885_v26 }
  0xa6   : > { %1533 = vmatmul.mubr.bf16.gmra.mrb[8].mxu0 %v917_v12  ;;  %2301 = vmatprep.subr.bf16.mxu1 %v2465_v44  ;;  %v871_v12 = vld [vmem:[%s3507_s0 + $0x310] sm:$0xff]  ;;  %v794_v42 = vld [vmem:[%s3507_s0 + $0xa8] sm:$0xff]  ;;  %v796_v44 = vld [vmem:[%s3507_s0 + $0xb8] sm:$0xff] }
  0xa7   : > { %1630 = vmatmul.mubr.bf16.gmra.mrb[8].mxu1 %v919_v14  ;;  %1540 = vmatprep.mubr.bf16.mxu0 %v926_v19  ;;  %v886_v14 = vld [vmem:[%s3507_s0 + $0x388] sm:$0xff]  ;;  %v2475_v19 = vld [vmem:[%s2923_s26 + $0x178] sm:$0xff]   ;;  %v951_v20 = vpack.c.bf16 %v879_v13, %v871_v12  ;;  %v827_v12 = vld [vmem:[%s3507_s0 + $0x1b0] sm:$0xff]  ;;  %s769_s26 = scalar_select %p768_p0, %s2549_s15, 1 }
  0xa8   : > { %1637 = vmatprep.mubr.bf16.mxu1 %v928_v23  ;;  %2238 = vmatpush3.bf16.msra.mxu0 %v2464_v43  ;;  %v958_v21 = vpack.c.bf16 %v894_v15, %v886_v14  ;;  %v960_v23 = vpack.c.bf16 %v896_v17, %v888_v16  ;;  %v802_v43 = vld [vmem:[%s3507_s0 + $0xe8] sm:$0xff]  ;;  %v835_v13 = vld [vmem:[%s3507_s0 + $0x1f0] sm:$0xff]  ;;  %v844_v16 = vld [vmem:[%s3507_s0 + $0x238] sm:$0xff]  ;;  %s1905_s15 = scalar_lea.sflag [#allocation4], %s2908_s6 }
  0xa9   : > { %2302 = vmatpush3.bf16.msra.mxu1 %v2466_v45  ;;  %2239 = vmatprep.subr.bf16.mxu0 %v2467_v54  ;;  %v804_v45 = vld [vmem:[%s3507_s0 + $0xf8] sm:$0xff]  ;;  %v810_v54 = vld [vmem:[%s3507_s0 + $0x128] sm:$0xff]  ;;  %s770_s29 = scalar_lea.vmem %s3509_s2, %s769_s26 }
  0xaa   : > { %2303 = vmatprep.subr.bf16.mxu1 %v2469_v59  ;;  %v916_v49 = vpack.c.bf16 %v804_v45, %v796_v44  ;;  %v842_v14 = vld [vmem:[%s3507_s0 + $0x228] sm:$0xff]  ;;  %v852_v17 = vld [vmem:[%s3507_s0 + $0x278] sm:$0xff]  ;;  %v954_v44 = vpack.c.bf16 %v882_v39, %v874_v38  ;;  %v956_v45 = vpack.c.bf16 %v884_v41, %v876_v40 }
  0xab   : > { %v850_v15 = vld [vmem:[%s3507_s0 + $0x268] sm:$0xff] }
  0xac   : > { %2240 = vmatpush3.bf16.msra.mxu0 %v2468_v57  ;;  %v820_v57 = vld [vmem:[%s3507_s0 + $0x178] sm:$0xff]  ;;  %v858_v26 = vld [vmem:[%s3507_s0 + $0x2a8] sm:$0xff] }
  0xad   : > { %2304 = vmatpush3.bf16.msra.mxu1 %v2470_v60  ;;  %2241 = vmatprep.subr.bf16.mxu0 %v2471_v5  ;;  %v922_v60 = vpack.c.bf16 %v818_v55, %v810_v54  ;;  %v924_v61 = vpack.c.bf16 %v820_v57, %v812_v56  ;;  %v836_v5 = vld [vmem:[%s3507_s0 + $0x1f8] sm:$0xff]  ;;  %v866_v27 = vld [vmem:[%s3507_s0 + $0x2e8] sm:$0xff] }
  0xae   : > { %1541 = vmatmul.mubr.bf16.gmra.mrb[12].mxu0 %v925_v29  ;;  %2305 = vmatprep.subr.bf16.mxu1 %v2473_v8  ;;  %v895_v29 = vld [vmem:[%s3507_s0 + $0x3d0] sm:$0xff] }
  0xaf   : > { %1638 = vmatmul.mubr.bf16.gmra.mrb[12].mxu1 %v927_v32  ;;  %1548 = vmatprep.mubr.bf16.mxu0 %v934_v36  ;;  %v780_v32 = vld [vmem:[%s3507_s0 + $0x38] sm:$0xff]  ;;  %v959_v35 = vpack.c.bf16 %v895_v29, %v887_v28  ;;  %v906_v36 = vpack.c.bf16 %v786_v31, %v778_v30 }
  0xb0   : > { %1645 = vmatprep.mubr.bf16.mxu1 %v936_v37  ;;  %2242 = vmatpush3.bf16.msra.mxu0 %v2472_v7  ;;  %v908_v37 = vpack.c.bf16 %v788_v33, %v780_v32  ;;  %v923_v7 = vpack.c.bf16 %v819_v1, %v811_v0  ;;  %v860_v28 = vld [vmem:[%s3507_s0 + $0x2b8] sm:$0xff]  ;;  %v946_v32 = vpack.c.bf16 %v866_v27, %v858_v26 }
  0xb1   : > { %2306 = vmatpush3.bf16.msra.mxu1 %v2474_v10  ;;  %2243 = vmatprep.subr.bf16.mxu0 %v2475_v19  ;;  %v825_v10 = vld [vmem:[%s3507_s0 + $0x1a0] sm:$0xff]  ;;  %v931_v19 = vpack.c.bf16 %v835_v13, %v827_v12  ;;  %v868_v29 = vld [vmem:[%s3507_s0 + $0x2f8] sm:$0xff] }
  0xb2   : > { %2307 = vmatprep.subr.bf16.mxu1 %v2477_v24  ;;  %v843_v24 = vld [vmem:[%s3507_s0 + $0x230] sm:$0xff]  ;;  %v948_v33 = vpack.c.bf16 %v868_v29, %v860_v28 }
  0xb4   : > { %2244 = vmatpush3.bf16.msra.mxu0 %v2476_v22  ;;  %v841_v22 = vld [vmem:[%s3507_s0 + $0x220] sm:$0xff] }
  0xb5   : > { %2308 = vmatpush3.bf16.msra.mxu1 %v2478_v25  ;;  %v851_v25 = vld [vmem:[%s3507_s0 + $0x270] sm:$0xff] }
  0xb6   : > { %1549 = vmatmul.mubr.bf16.gmra.mrb[16].mxu0 %v933_v48  ;;  %v914_v48 = vpack.c.bf16 %v802_v43, %v794_v42  ;;  %v939_v31 = vpack.c.bf16 %v851_v25, %v843_v24 }
  0xb7   : > { %1646 = vmatmul.mubr.bf16.gmra.mrb[16].mxu1 %v935_v51  ;;  %1556 = vmatprep.mubr.bf16.mxu0 %v942_v52  ;;  %v801_v51 = vld [vmem:[%s3507_s0 + $0xe0] sm:$0xff]  ;;  %v795_v52 = vld [vmem:[%s3507_s0 + $0xb0] sm:$0xff] }
  0xb8   : > { %1653 = vmatprep.mubr.bf16.mxu1 %v944_v53  ;;  %v803_v53 = vld [vmem:[%s3507_s0 + $0xf0] sm:$0xff]  ;;  %v913_v58 = vpack.c.bf16 %v801_v51, %v793_v50  ;;  %v890_v50 = vld [vmem:[%s3507_s0 + $0x3a8] sm:$0xff] }
  0xb9   : > { %v915_v59 = vpack.c.bf16 %v803_v53, %v795_v52  ;;  %v898_v51 = vld [vmem:[%s3507_s0 + $0x3e8] sm:$0xff]  ;;  %v892_v52 = vld [vmem:[%s3507_s0 + $0x3b8] sm:$0xff] }
  0xba   : > { %v900_v53 = vld [vmem:[%s3507_s0 + $0x3f8] sm:$0xff]  ;;  %v962_v56 = vpack.c.bf16 %v898_v51, %v890_v50 }
  0xbb   : > { %v964_v57 = vpack.c.bf16 %v900_v53, %v892_v52 }
  0xbe   : > { %1557 = vmatmul.mubr.bf16.gmra.mrb[20].mxu0 %v941_v2  ;;  %v826_v2 = vld [vmem:[%s3507_s0 + $0x1a8] sm:$0xff] }
  0xbf   : > { %1654 = vmatmul.mubr.bf16.gmra.mrb[20].mxu1 %v943_v3  ;;  %1564 = vmatprep.mubr.bf16.mxu0 %v950_v4  ;;  %v834_v3 = vld [vmem:[%s3507_s0 + $0x1e8] sm:$0xff]  ;;  %v828_v4 = vld [vmem:[%s3507_s0 + $0x1b8] sm:$0xff] }
  0xc0   : > { %1661 = vmatprep.mubr.bf16.mxu1 %v952_v6  ;;  %v921_v6 = vpack.c.bf16 %v817_v63, %v809_v62  ;;  %v930_v8 = vpack.c.bf16 %v834_v3, %v826_v2  ;;  %v932_v9 = vpack.c.bf16 %v836_v5, %v828_v4  ;;  %v3366_v2 = vld [vmem:[%s770_s29] ss:$0 sm:$0xff] }
  0xc6   : > { %1565 = vmatmul.mubr.bf16.gmra.mrb[24].mxu0 %v949_v18  ;;  %v929_v18 = vpack.c.bf16 %v833_v11, %v825_v10 }
  0xc7   : > { %1662 = vmatmul.mubr.bf16.gmra.mrb[24].mxu1 %v951_v20  ;;  %1572 = vmatprep.mubr.bf16.mxu0 %v958_v21  ;;  %v938_v20 = vpack.c.bf16 %v850_v15, %v842_v14  ;;  %v940_v21 = vpack.c.bf16 %v852_v17, %v844_v16 }
  0xc8   : > { %1669 = vmatprep.mubr.bf16.mxu1 %v960_v23  ;;  %v849_v23 = vld [vmem:[%s3507_s0 + $0x260] sm:$0xff] }
  0xc9   : > { %v937_v30 = vpack.c.bf16 %v849_v23, %v841_v22 }
  0xce   : > { %1573 = vmatmul.mubr.bf16.gmra.mrb[28].mxu0 %v957_v34  ;;  %v857_v34 = vld [vmem:[%s3507_s0 + $0x2a0] sm:$0xff] }
  0xcf   : > { %1670 = vmatmul.mubr.bf16.gmra.mrb[28].mxu1 %v959_v35  ;;  %1710 = vmatprep.mubr.bf16.mxu0 %v906_v36  ;;  %v865_v35 = vld [vmem:[%s3507_s0 + $0x2e0] sm:$0xff]  ;;  %v859_v36 = vld [vmem:[%s3507_s0 + $0x2b0] sm:$0xff] }
  0xd0   : > { %1807 = vmatprep.mubr.bf16.mxu1 %v908_v37  ;;  %v867_v37 = vld [vmem:[%s3507_s0 + $0x2f0] sm:$0xff]  ;;  %v945_v42 = vpack.c.bf16 %v865_v35, %v857_v34 }
  0xd1   : > { %v947_v43 = vpack.c.bf16 %v867_v37, %v859_v36 }
  0xd6   : > { %1711 = vmatmul.mubr.bf16.vlgmr.msra.gmra.mrb[32].mxu0 %v905_v46  ;;  %v873_v46 = vld [vmem:[%s3507_s0 + $0x320] sm:$0xff] }
  0xd7   : > { %1808 = vmatmul.mubr.bf16.vlgmr.msra.gmra.mrb[32].mxu1 %v907_v47  ;;  %1718 = vmatprep.mubr.bf16.mxu0 %v914_v48  ;;  %v881_v47 = vld [vmem:[%s3507_s0 + $0x360] sm:$0xff]  ;;  %v875_v48 = vld [vmem:[%s3507_s0 + $0x330] sm:$0xff] }
  0xd8   : > { %1815 = vmatprep.mubr.bf16.mxu1 %v916_v49  ;;  %v883_v49 = vld [vmem:[%s3507_s0 + $0x370] sm:$0xff]  ;;  %v953_v54 = vpack.c.bf16 %v881_v47, %v873_v46 }
  0xd9   : > { %v955_v55 = vpack.c.bf16 %v883_v49, %v875_v48 }
  0xde   : > { %1719 = vmatmul.mubr.bf16.gmra.mrb[36].mxu0 %v913_v58  ;;  %v889_v58 = vld [vmem:[%s3507_s0 + $0x3a0] sm:$0xff] }
  0xdf   : > { %1816 = vmatmul.mubr.bf16.gmra.mrb[36].mxu1 %v915_v59  ;;  %1726 = vmatprep.mubr.bf16.mxu0 %v922_v60  ;;  %v897_v59 = vld [vmem:[%s3507_s0 + $0x3e0] sm:$0xff]  ;;  %v891_v60 = vld [vmem:[%s3507_s0 + $0x3b0] sm:$0xff] }
  0xe0   : > { %1823 = vmatprep.mubr.bf16.mxu1 %v924_v61  ;;  %v899_v61 = vld [vmem:[%s3507_s0 + $0x3f0] sm:$0xff]  ;;  %v961_v62 = vpack.c.bf16 %v897_v59, %v889_v58 }
  0xe1   : > { %v963_v63 = vpack.c.bf16 %v899_v61, %v891_v60 }
  0xe6   : > { %1727 = vmatmul.mubr.bf16.gmra.mrb[40].mxu0 %v921_v6 }
  0xe7   : > { %1824 = vmatmul.mubr.bf16.gmra.mrb[40].mxu1 %v923_v7  ;;  %1734 = vmatprep.mubr.bf16.mxu0 %v930_v8 }
  0xe8   : > { %1831 = vmatprep.mubr.bf16.mxu1 %v932_v9 }
  0xee   : > { %1735 = vmatmul.mubr.bf16.gmra.mrb[44].mxu0 %v929_v18 }
  0xef   : > { %1832 = vmatmul.mubr.bf16.gmra.mrb[44].mxu1 %v931_v19  ;;  %1742 = vmatprep.mubr.bf16.mxu0 %v938_v20 }
  0xf0   : > { %1839 = vmatprep.mubr.bf16.mxu1 %v940_v21 }
  0xf6   : > { %1743 = vmatmul.mubr.bf16.gmra.mrb[48].mxu0 %v937_v30 }
  0xf7   : > { %1840 = vmatmul.mubr.bf16.gmra.mrb[48].mxu1 %v939_v31  ;;  %1750 = vmatprep.mubr.bf16.mxu0 %v946_v32 }
  0xf8   : > { %1847 = vmatprep.mubr.bf16.mxu1 %v948_v33 }
  0xfe   : > { %1751 = vmatmul.mubr.bf16.gmra.mrb[52].mxu0 %v945_v42 }
  0xff   : > { %1848 = vmatmul.mubr.bf16.gmra.mrb[52].mxu1 %v947_v43  ;;  %1758 = vmatprep.mubr.bf16.mxu0 %v954_v44 }
 0x100   : > { %1855 = vmatprep.mubr.bf16.mxu1 %v956_v45 }
 0x106   : > { %1759 = vmatmul.mubr.bf16.gmra.mrb[56].mxu0 %v953_v54 }
 0x107   : > { %1856 = vmatmul.mubr.bf16.gmra.mrb[56].mxu1 %v955_v55  ;;  %1766 = vmatprep.mubr.bf16.mxu0 %v962_v56 }
 0x108   : > { %1863 = vmatprep.mubr.bf16.mxu1 %v964_v57 }
 0x10e   : > { %1767 = vmatmul.mubr.bf16.gmra.mrb[60].mxu0 %v961_v62 }
 0x10f   : > { %1864 = vmatmul.mubr.bf16.gmra.mrb[60].mxu1 %v963_v63 }
 0x169   : > { %v2117_v0 = vpop.f32.mrb[0].mxu0 }
 0x16a   : > { %v2181_v1 = vpop.f32.mrb[0].mxu1  ;;  %v2118_v3 = vpop.f32.mrb[1].mxu0 }
 0x16b   : > { %v2119_v4 = vadd.f32 %v2118_v3, %v2117_v0  ;;  %v2182_v5 = vpop.f32.mrb[1].mxu1  ;;  %v2120_v6 = vpop.f32.mrb[2].mxu0 }
 0x16c   : > { %v2183_v7 = vadd.f32 %v2182_v5, %v2181_v1  ;;  %v2184_v8 = vpop.f32.mrb[2].mxu1  ;;  %v2121_v9 = vpop.f32.mrb[3].mxu0 }
 0x16d   : > { %v1519_v10 = vadd.f32 %v2119_v4, %v3366_v2  ;;  %v2122_v11 = vadd.f32 %v2121_v9, %v2120_v6  ;;  %v2185_v12 = vpop.f32.mrb[3].mxu1 }
 0x16e   : > { %v2186_v13 = vadd.f32 %v2185_v12, %v2184_v8 }
 0x16f   : > { %v3369_v14 = vadd.f32 %v2183_v7, %v1519_v10  ;;  %v1522_v15 = vadd.f32 %v2122_v11, %v3366_v2 }
 0x171   : > { %v3372_v16 = vadd.f32 %v2186_v13, %v1522_v15  ;;  %v2123_v17 = vpop.f32.mrb[4].mxu0 }
 0x172   : > { %v2187_v18 = vpop.f32.mrb[4].mxu1  ;;  %v2124_v19 = vpop.f32.mrb[5].mxu0 }
 0x173   : > { %v2125_v20 = vadd.f32 %v2124_v19, %v2123_v17  ;;  %v2188_v21 = vpop.f32.mrb[5].mxu1  ;;  %v2126_v22 = vpop.f32.mrb[6].mxu0 }
 0x174   : > { %v2189_v23 = vadd.f32 %v2188_v21, %v2187_v18  ;;  %v2190_v24 = vpop.f32.mrb[6].mxu1  ;;  %v2127_v25 = vpop.f32.mrb[7].mxu0 }
 0x175   : > { %v1527_v26 = vadd.f32 %v2125_v20, %v3366_v2  ;;  %v2128_v27 = vadd.f32 %v2127_v25, %v2126_v22  ;;  %v2191_v28 = vpop.f32.mrb[7].mxu1 }
 0x176   : > { %v2192_v29 = vadd.f32 %v2191_v28, %v2190_v24 }
 0x177   : > { %v3375_v30 = vadd.f32 %v2189_v23, %v1527_v26  ;;  %v1530_v31 = vadd.f32 %v2128_v27, %v3366_v2 }
 0x179   : > { %v3378_v32 = vadd.f32 %v2192_v29, %v1530_v31  ;;  %v2129_v33 = vpop.f32.mrb[8].mxu0 }
 0x17a   : > { %v2193_v34 = vpop.f32.mrb[8].mxu1  ;;  %v2130_v35 = vpop.f32.mrb[9].mxu0 }
 0x17b   : > { %v2131_v36 = vadd.f32 %v2130_v35, %v2129_v33  ;;  %v2194_v37 = vpop.f32.mrb[9].mxu1  ;;  %v2132_v38 = vpop.f32.mrb[10].mxu0 }
 0x17c   : > { %v2195_v39 = vadd.f32 %v2194_v37, %v2193_v34  ;;  %v2196_v40 = vpop.f32.mrb[10].mxu1  ;;  %v2133_v41 = vpop.f32.mrb[11].mxu0 }
 0x17d   : > { %v1535_v42 = vadd.f32 %v2131_v36, %v3366_v2  ;;  %v2134_v43 = vadd.f32 %v2133_v41, %v2132_v38  ;;  %v2197_v44 = vpop.f32.mrb[11].mxu1 }
 0x17e   : > { %v2198_v45 = vadd.f32 %v2197_v44, %v2196_v40 }
 0x17f   : > { %v3381_v46 = vadd.f32 %v2195_v39, %v1535_v42  ;;  %v1538_v47 = vadd.f32 %v2134_v43, %v3366_v2 }
 0x181   : > { %v3384_v48 = vadd.f32 %v2198_v45, %v1538_v47  ;;  %v2135_v49 = vpop.f32.mrb[12].mxu0 }
 0x182   : > { %v2199_v50 = vpop.f32.mrb[12].mxu1  ;;  %v2136_v51 = vpop.f32.mrb[13].mxu0 }
 0x183   : > { %v2137_v52 = vadd.f32 %v2136_v51, %v2135_v49  ;;  %v2200_v53 = vpop.f32.mrb[13].mxu1  ;;  %v2138_v54 = vpop.f32.mrb[14].mxu0 }
 0x184   : > { %v2201_v55 = vadd.f32 %v2200_v53, %v2199_v50  ;;  %v2202_v56 = vpop.f32.mrb[14].mxu1  ;;  %v2139_v57 = vpop.f32.mrb[15].mxu0 }
 0x185   : > { %v1543_v58 = vadd.f32 %v2137_v52, %v3366_v2  ;;  %v2140_v59 = vadd.f32 %v2139_v57, %v2138_v54  ;;  %v2203_v60 = vpop.f32.mrb[15].mxu1 }
 0x186   : > { %v2204_v61 = vadd.f32 %v2203_v60, %v2202_v56 }
 0x187   : > { %v3387_v62 = vadd.f32 %v2201_v55, %v1543_v58  ;;  %v1546_v63 = vadd.f32 %v2140_v59, %v3366_v2 }
 0x189   : > { %v3390_v0 = vadd.f32 %v2204_v61, %v1546_v63  ;;  %v2141_v1 = vpop.f32.mrb[16].mxu0 }
 0x18a   : > { %v2205_v3 = vpop.f32.mrb[16].mxu1  ;;  %v2142_v4 = vpop.f32.mrb[17].mxu0 }
 0x18b   : > { %v2143_v5 = vadd.f32 %v2142_v4, %v2141_v1  ;;  %v2206_v6 = vpop.f32.mrb[17].mxu1  ;;  %v2144_v7 = vpop.f32.mrb[18].mxu0 }
 0x18c   : > { %v2207_v8 = vadd.f32 %v2206_v6, %v2205_v3  ;;  %v2208_v9 = vpop.f32.mrb[18].mxu1  ;;  %v2145_v10 = vpop.f32.mrb[19].mxu0 }
 0x18d   : > { %v1551_v11 = vadd.f32 %v2143_v5, %v3366_v2  ;;  %v2146_v12 = vadd.f32 %v2145_v10, %v2144_v7  ;;  %v2209_v13 = vpop.f32.mrb[19].mxu1 }
 0x18e   : > { %v2210_v15 = vadd.f32 %v2209_v13, %v2208_v9 }
 0x18f   : > { %v3393_v17 = vadd.f32 %v2207_v8, %v1551_v11  ;;  %v1554_v18 = vadd.f32 %v2146_v12, %v3366_v2 }
 0x191   : > { %v3396_v19 = vadd.f32 %v2210_v15, %v1554_v18  ;;  %v2147_v20 = vpop.f32.mrb[20].mxu0 }
 0x192   : > { %v2211_v21 = vpop.f32.mrb[20].mxu1  ;;  %v2148_v22 = vpop.f32.mrb[21].mxu0 }
 0x193   : > { %v2149_v23 = vadd.f32 %v2148_v22, %v2147_v20  ;;  %v2212_v24 = vpop.f32.mrb[21].mxu1  ;;  %v2150_v25 = vpop.f32.mrb[22].mxu0 }
 0x194   : > { %v2213_v26 = vadd.f32 %v2212_v24, %v2211_v21  ;;  %v2214_v27 = vpop.f32.mrb[22].mxu1  ;;  %v2151_v28 = vpop.f32.mrb[23].mxu0 }
 0x195   : > { %v1559_v29 = vadd.f32 %v2149_v23, %v3366_v2  ;;  %v2152_v31 = vadd.f32 %v2151_v28, %v2150_v25  ;;  %v2215_v33 = vpop.f32.mrb[23].mxu1 }
 0x196   : > { %v2216_v34 = vadd.f32 %v2215_v33, %v2214_v27 }
 0x197   : > { %v3399_v35 = vadd.f32 %v2213_v26, %v1559_v29  ;;  %v1562_v36 = vadd.f32 %v2152_v31, %v3366_v2 }
 0x199   : > { %v3402_v37 = vadd.f32 %v2216_v34, %v1562_v36  ;;  %v2153_v38 = vpop.f32.mrb[24].mxu0 }
 0x19a   : > { %v2217_v39 = vpop.f32.mrb[24].mxu1  ;;  %v2154_v40 = vpop.f32.mrb[25].mxu0 }
 0x19b   : > { %v2155_v41 = vadd.f32 %v2154_v40, %v2153_v38  ;;  %v2218_v42 = vpop.f32.mrb[25].mxu1  ;;  %v2156_v43 = vpop.f32.mrb[26].mxu0 }
 0x19c   : > { %v2219_v44 = vadd.f32 %v2218_v42, %v2217_v39  ;;  %v2220_v45 = vpop.f32.mrb[26].mxu1  ;;  %v2157_v47 = vpop.f32.mrb[27].mxu0 }
 0x19d   : > { %v1567_v49 = vadd.f32 %v2155_v41, %v3366_v2  ;;  %v2158_v50 = vadd.f32 %v2157_v47, %v2156_v43  ;;  %v2221_v51 = vpop.f32.mrb[27].mxu1 }
 0x19e   : > { %v2222_v52 = vadd.f32 %v2221_v51, %v2220_v45 }
 0x19f   : > { %v3405_v53 = vadd.f32 %v2219_v44, %v1567_v49  ;;  %v1570_v54 = vadd.f32 %v2158_v50, %v3366_v2 }
 0x1a1   : > { %v3408_v55 = vadd.f32 %v2222_v52, %v1570_v54  ;;  %v2159_v56 = vpop.f32.mrb[28].mxu0 }
 0x1a2   : > { %v2223_v57 = vpop.f32.mrb[28].mxu1  ;;  %v2160_v58 = vpop.f32.mrb[29].mxu0 }
 0x1a3   : > { %v2161_v59 = vadd.f32 %v2160_v58, %v2159_v56  ;;  %v2224_v60 = vpop.f32.mrb[29].mxu1  ;;  %v2162_v61 = vpop.f32.mrb[30].mxu0 }
 0x1a4   : > { %v2225_v63 = vadd.f32 %v2224_v60, %v2223_v57  ;;  %v2226_v1 = vpop.f32.mrb[30].mxu1  ;;  %v2163_v3 = vpop.f32.mrb[31].mxu0 }
 0x1a5   : > { %v1575_v4 = vadd.f32 %v2161_v59, %v3366_v2  ;;  %v2164_v5 = vadd.f32 %v2163_v3, %v2162_v61  ;;  %v2227_v6 = vpop.f32.mrb[31].mxu1 }
 0x1a6   : > { %v2228_v7 = vadd.f32 %v2227_v6, %v2226_v1 }
 0x1a7   : > { %v3411_v8 = vadd.f32 %v2225_v63, %v1575_v4  ;;  %v1578_v9 = vadd.f32 %v2164_v5, %v3366_v2 }
 0x1a9   : > { %v3414_v10 = vadd.f32 %v2228_v7, %v1578_v9  ;;  %v2245_v11 = vpop.f32.mrb[32].mxu0 }
 0x1aa   : > { %v2309_v12 = vpop.f32.mrb[32].mxu1  ;;  %v2246_v13 = vpop.f32.mrb[33].mxu0 }
 0x1ab   : > { %v2247_v15 = vadd.f32 %v2246_v13, %v2245_v11  ;;  %v2310_v18 = vpop.f32.mrb[33].mxu1  ;;  %v2248_v20 = vpop.f32.mrb[34].mxu0 }
 0x1ac   : > { %v2311_v21 = vadd.f32 %v2310_v18, %v2309_v12  ;;  %v2312_v22 = vpop.f32.mrb[34].mxu1  ;;  %v2249_v23 = vpop.f32.mrb[35].mxu0 }
 0x1ad   : > { %v1713_v24 = vadd.f32 %v2247_v15, %v3369_v14  ;;  %v2250_v25 = vadd.f32 %v2249_v23, %v2248_v20  ;;  %v2313_v26 = vpop.f32.mrb[35].mxu1 }
 0x1ae   : > { %v2314_v27 = vadd.f32 %v2313_v26, %v2312_v22 }
 0x1af   : > { %v1810_v28 = vadd.f32 %v2311_v21, %v1713_v24  ;;  %v1716_v2 = vadd.f32 %v2250_v25, %v3372_v16 }
 0x1b1   : > { %v1872_v29 = vmax.f32 %v1810_v28, 0.0  ;;  %v1813_v31 = vadd.f32 %v2314_v27, %v1716_v2  ;;  %v2251_v33 = vpop.f32.mrb[36].mxu0 }
 0x1b2   : > { %v2315_v34 = vpop.f32.mrb[36].mxu1  ;;  %v2252_v36 = vpop.f32.mrb[37].mxu0 }
 0x1b3   : > { %1888 = vst [vmem:[%s3419_s4] sm:$0xff] %v1872_v29  ;;  %v1873_v38 = vmax.f32 %v1813_v31, 0.0  ;;  %v2253_v39 = vadd.f32 %v2252_v36, %v2251_v33  ;;  %v2316_v14 = vpop.f32.mrb[37].mxu1  ;;  %v2254_v40 = vpop.f32.mrb[38].mxu0 }
 0x1b4   : > { %v2317_v41 = vadd.f32 %v2316_v14, %v2315_v34  ;;  %v2318_v42 = vpop.f32.mrb[38].mxu1  ;;  %v2255_v43 = vpop.f32.mrb[39].mxu0 }
 0x1b5   : > { %1889 = vst [vmem:[%s3419_s4 + $0x8] sm:$0xff] %v1873_v38  ;;  %v1721_v16 = vadd.f32 %v2253_v39, %v3375_v30  ;;  %v2256_v44 = vadd.f32 %v2255_v43, %v2254_v40  ;;  %v2319_v45 = vpop.f32.mrb[39].mxu1 }
 0x1b6   : > { %v2320_v47 = vadd.f32 %v2319_v45, %v2318_v42 }
 0x1b7   : > { %v1818_v49 = vadd.f32 %v2317_v41, %v1721_v16  ;;  %v1724_v50 = vadd.f32 %v2256_v44, %v3378_v32 }
 0x1b9   : > { %v1874_v51 = vmax.f32 %v1818_v49, 0.0  ;;  %v1821_v52 = vadd.f32 %v2320_v47, %v1724_v50  ;;  %v2257_v54 = vpop.f32.mrb[40].mxu0 }
 0x1ba   : > { %v2321_v56 = vpop.f32.mrb[40].mxu1  ;;  %v2258_v57 = vpop.f32.mrb[41].mxu0 }
 0x1bb   : > { %1890 = vst [vmem:[%s3419_s4 + $0x10] sm:$0xff] %v1874_v51  ;;  %v1875_v58 = vmax.f32 %v1821_v52, 0.0  ;;  %v2259_v59 = vadd.f32 %v2258_v57, %v2257_v54  ;;  %v2322_v60 = vpop.f32.mrb[41].mxu1  ;;  %v2260_v61 = vpop.f32.mrb[42].mxu0 }
 0x1bc   : > { %v2323_v63 = vadd.f32 %v2322_v60, %v2321_v56  ;;  %v2324_v30 = vpop.f32.mrb[42].mxu1  ;;  %v2261_v1 = vpop.f32.mrb[43].mxu0 }
 0x1bd   : > { %1891 = vst [vmem:[%s3419_s4 + $0x18] sm:$0xff] %v1875_v58  ;;  %v1729_v3 = vadd.f32 %v2259_v59, %v3381_v46  ;;  %v2262_v4 = vadd.f32 %v2261_v1, %v2260_v61  ;;  %v2325_v5 = vpop.f32.mrb[43].mxu1 }
 0x1be   : > { %v2326_v32 = vadd.f32 %v2325_v5, %v2324_v30 }
 0x1bf   : > { %v1826_v6 = vadd.f32 %v2323_v63, %v1729_v3  ;;  %v1732_v7 = vadd.f32 %v2262_v4, %v3384_v48 }
 0x1c1   : > { %v1876_v9 = vmax.f32 %v1826_v6, 0.0  ;;  %v1829_v11 = vadd.f32 %v2326_v32, %v1732_v7  ;;  %v2263_v12 = vpop.f32.mrb[44].mxu0 }
 0x1c2   : > { %v2327_v13 = vpop.f32.mrb[44].mxu1  ;;  %v2264_v15 = vpop.f32.mrb[45].mxu0 }
 0x1c3   : > { %1892 = vst [vmem:[%s3419_s4 + $0x20] sm:$0xff] %v1876_v9  ;;  %v1877_v18 = vmax.f32 %v1829_v11, 0.0  ;;  %v2265_v20 = vadd.f32 %v2264_v15, %v2263_v12  ;;  %v2328_v21 = vpop.f32.mrb[45].mxu1  ;;  %v2266_v22 = vpop.f32.mrb[46].mxu0 }
 0x1c4   : > { %v2329_v23 = vadd.f32 %v2328_v21, %v2327_v13  ;;  %v2330_v46 = vpop.f32.mrb[46].mxu1  ;;  %v2267_v24 = vpop.f32.mrb[47].mxu0 }
 0x1c5   : > { %1893 = vst [vmem:[%s3419_s4 + $0x28] sm:$0xff] %v1877_v18  ;;  %v1737_v25 = vadd.f32 %v2265_v20, %v3387_v62  ;;  %v2268_v26 = vadd.f32 %v2267_v24, %v2266_v22  ;;  %v2331_v27 = vpop.f32.mrb[47].mxu1 }
 0x1c6   : > { %v2332_v48 = vadd.f32 %v2331_v27, %v2330_v46 }
 0x1c7   : > { %v1834_v28 = vadd.f32 %v2329_v23, %v1737_v25  ;;  %v1740_v2 = vadd.f32 %v2268_v26, %v3390_v0 }
 0x1c9   : > { %v1878_v29 = vmax.f32 %v1834_v28, 0.0  ;;  %v1837_v31 = vadd.f32 %v2332_v48, %v1740_v2  ;;  %v2269_v33 = vpop.f32.mrb[48].mxu0 }
 0x1ca   : > { %v2333_v34 = vpop.f32.mrb[48].mxu1  ;;  %v2270_v36 = vpop.f32.mrb[49].mxu0 }
 0x1cb   : > { %1894 = vst [vmem:[%s3419_s4 + $0x30] sm:$0xff] %v1878_v29  ;;  %v1879_v38 = vmax.f32 %v1837_v31, 0.0  ;;  %v2271_v39 = vadd.f32 %v2270_v36, %v2269_v33  ;;  %v2334_v14 = vpop.f32.mrb[49].mxu1  ;;  %v2272_v40 = vpop.f32.mrb[50].mxu0 }
 0x1cc   : > { %v2335_v41 = vadd.f32 %v2334_v14, %v2333_v34  ;;  %v2336_v62 = vpop.f32.mrb[50].mxu1  ;;  %v2273_v42 = vpop.f32.mrb[51].mxu0 }
 0x1cd   : > { %1895 = vst [vmem:[%s3419_s4 + $0x38] sm:$0xff] %v1879_v38  ;;  %v1745_v43 = vadd.f32 %v2271_v39, %v3393_v17  ;;  %v2274_v16 = vadd.f32 %v2273_v42, %v2272_v40  ;;  %v2337_v44 = vpop.f32.mrb[51].mxu1 }
 0x1ce   : > { %v2338_v0 = vadd.f32 %v2337_v44, %v2336_v62 }
 0x1cf   : > { %v1842_v45 = vadd.f32 %v2335_v41, %v1745_v43  ;;  %v1748_v47 = vadd.f32 %v2274_v16, %v3396_v19 }
 0x1d1   : > { %v1880_v49 = vmax.f32 %v1842_v45, 0.0  ;;  %v1845_v50 = vadd.f32 %v2338_v0, %v1748_v47  ;;  %v2275_v51 = vpop.f32.mrb[52].mxu0 }
 0x1d2   : > { %v2339_v52 = vpop.f32.mrb[52].mxu1  ;;  %v2276_v54 = vpop.f32.mrb[53].mxu0 }
 0x1d3   : > { %1896 = vst [vmem:[%s3419_s4 + $0x40] sm:$0xff] %v1880_v49  ;;  %v1881_v56 = vmax.f32 %v1845_v50, 0.0  ;;  %v2277_v57 = vadd.f32 %v2276_v54, %v2275_v51  ;;  %v2340_v58 = vpop.f32.mrb[53].mxu1  ;;  %v2278_v59 = vpop.f32.mrb[54].mxu0 }
 0x1d4   : > { %v2341_v60 = vadd.f32 %v2340_v58, %v2339_v52  ;;  %v2342_v17 = vpop.f32.mrb[54].mxu1  ;;  %v2279_v61 = vpop.f32.mrb[55].mxu0 }
 0x1d5   : > { %1897 = vst [vmem:[%s3419_s4 + $0x48] sm:$0xff] %v1881_v56  ;;  %v1753_v63 = vadd.f32 %v2277_v57, %v3399_v35  ;;  %v2280_v30 = vadd.f32 %v2279_v61, %v2278_v59  ;;  %v2343_v1 = vpop.f32.mrb[55].mxu1 }
 0x1d6   : > { %v2344_v19 = vadd.f32 %v2343_v1, %v2342_v17 }
 0x1d7   : > { %v1850_v3 = vadd.f32 %v2341_v60, %v1753_v63  ;;  %v1756_v4 = vadd.f32 %v2280_v30, %v3402_v37 }
 0x1d9   : > { %v1882_v5 = vmax.f32 %v1850_v3, 0.0  ;;  %v1853_v32 = vadd.f32 %v2344_v19, %v1756_v4  ;;  %v2281_v6 = vpop.f32.mrb[56].mxu0 }
 0x1da   : > { %v2345_v7 = vpop.f32.mrb[56].mxu1  ;;  %v2282_v9 = vpop.f32.mrb[57].mxu0 }
 0x1db   : > { %1898 = vst [vmem:[%s3419_s4 + $0x50] sm:$0xff] %v1882_v5  ;;  %v1883_v11 = vmax.f32 %v1853_v32, 0.0  ;;  %v2283_v12 = vadd.f32 %v2282_v9, %v2281_v6  ;;  %v2346_v13 = vpop.f32.mrb[57].mxu1  ;;  %v2284_v15 = vpop.f32.mrb[58].mxu0 }
 0x1dc   : > { %v2347_v18 = vadd.f32 %v2346_v13, %v2345_v7  ;;  %v2348_v35 = vpop.f32.mrb[58].mxu1  ;;  %v2285_v20 = vpop.f32.mrb[59].mxu0 }
 0x1dd   : > { %1899 = vst [vmem:[%s3419_s4 + $0x58] sm:$0xff] %v1883_v11  ;;  %v1761_v21 = vadd.f32 %v2283_v12, %v3405_v53  ;;  %v2286_v22 = vadd.f32 %v2285_v20, %v2284_v15  ;;  %v2349_v23 = vpop.f32.mrb[59].mxu1 }
 0x1de   : > { %v2350_v37 = vadd.f32 %v2349_v23, %v2348_v35 }
 0x1df   : > { %v1858_v46 = vadd.f32 %v2347_v18, %v1761_v21  ;;  %v1764_v24 = vadd.f32 %v2286_v22, %v3408_v55 }
 0x1e1   : > { %v1884_v25 = vmax.f32 %v1858_v46, 0.0  ;;  %v1861_v26 = vadd.f32 %v2350_v37, %v1764_v24  ;;  %v2287_v27 = vpop.f32.mrb[60].mxu0 }
 0x1e2   : > { %v2351_v48 = vpop.f32.mrb[60].mxu1  ;;  %v2288_v28 = vpop.f32.mrb[61].mxu0 }
 0x1e3   : > { %1900 = vst [vmem:[%s3419_s4 + $0x60] sm:$0xff] %v1884_v25  ;;  %v1885_v2 = vmax.f32 %v1861_v26, 0.0  ;;  %v2289_v29 = vadd.f32 %v2288_v28, %v2287_v27  ;;  %v2352_v31 = vpop.f32.mrb[61].mxu1  ;;  %v2290_v33 = vpop.f32.mrb[62].mxu0 }
 0x1e4   : > { %v2353_v53 = vadd.f32 %v2352_v31, %v2351_v48  ;;  %v2354_v34 = vpop.f32.mrb[62].mxu1  ;;  %v2291_v36 = vpop.f32.mrb[63].mxu0 }
 0x1e5   : > { %1901 = vst [vmem:[%s3419_s4 + $0x68] sm:$0xff] %v1885_v2  ;;  %v1769_v55 = vadd.f32 %v2289_v29, %v3411_v8  ;;  %v2292_v38 = vadd.f32 %v2291_v36, %v2290_v33  ;;  %v2355_v39 = vpop.f32.mrb[63].mxu1 }
 0x1e6   : > { %v2356_v14 = vadd.f32 %v2355_v39, %v2354_v34 }
 0x1e7   : > { %v1866_v40 = vadd.f32 %v2353_v53, %v1769_v55  ;;  %v1772_v41 = vadd.f32 %v2292_v38, %v3414_v10 }
 0x1e9   : > { %v1886_v62 = vmax.f32 %v1866_v40, 0.0  ;;  %v1869_v42 = vadd.f32 %v2356_v14, %v1772_v41 }
 0x1eb   : > { %1902 = vst [vmem:[%s3419_s4 + $0x70] sm:$0xff] %v1886_v62  ;;  %v1887_v8 = vmax.f32 %v1869_v42, 0.0 }
 0x1ed   : > { %1903 = vst [vmem:[%s3419_s4 + $0x78] sm:$0xff] %v1887_v8 }
 0x1ee   : > { %2492 = shalt.err (!%p2489_p8)
}
 0x1ef   : > { %s2493_s23 = scalar_lea.hbm %s3454_s10, 2048  ;;  %s2497_s28 = scalar_lea.hbm %s3510_s3, 4096 }
 0x1f0   : > { %p2494_p11 = scmp.ne.s32.totalorder %s3454_s10, %s2493_s23  ;;  %p2498_p0 = scmp.lt.u32.totalorder %s3454_s10, %s3510_s3 }
 0x1f1   : > { %p2499_p1 = scmp.lt.u32.totalorder %s2497_s28, %s2493_s23  ;;  %p2501_p3 = scmp.lt.u32.totalorder %s2493_s23, %s3454_s10 }
 0x1f2   : > { %p2495_p12 = pnand %p2494_p11, %p2622_p5 }
 0x1f3   : > { %p2500_p2 = por %p2499_p1, %p2498_p0 }
 0x1f4   : > { %p2496_p13 = pneg %p2495_p12 }
 0x1f5   : > { %p2502_p4 = por %p2501_p3, %p2500_p2 }
 0x1f7   : > { %p2503_p6 = pnand %p2502_p4, %p2496_p13 }
 0x1f9   : > { %2506 = shalt.err (!%p2503_p6)
}
 0x1fa   : > { %s2560_s4 = smov 128   ;;  %s2561_s5 = smov 256  }
 0x1fb   : > { %s2562_s8 = smov 8  }
 0x1fc   : > { %2357 = dma.vmem_to_hbm [thread:$0]  (%p2622_p5), %s3456_s7, 2048, %s3454_s10, %s1905_s15, %s2560_s4, %s2561_s5, %s2562_s8  }
 0x1fd PF: > { %s1935_s9 = sand.u32 1, %s2537_s12   ;;  %p2360_p7 = pnand %p2026_p10, %p2633_p9 }
 0x1fe   : > { %s1936_s11 = scalar_lea.sflag [#allocation4], %s1935_s9 }
 0x1ff   : > { %2532 = dma.done.wait (!%p2360_p7), %s1936_s11, 2048  }
 0x200   : > { %2534 = vsyncadd (!%p2360_p7), %s1936_s11, 4294965248  ;;  %s16_s17 = sadd.s32 1, %s2557_s17   ;;  %s3513_s12 = smov %s2541_s13 }
 0x201   : > { %p13_p8 = scmp.ge.s32.totalorder %s16_s17, 4   ;;  %s3514_s13 = smov %s2545_s14 }
 0x202   : > { %s3515_s14 = smov %s2631_s24  ;;  %s3516_s15 = smov %s2553_s16 }
 0x203   : > { %s3517_s16 = smov %s3519_s20  ;;  %15 = sbr.rel (!%p13_p8) target bundleno = 4 (0x4), region = 119 }
 0x20a   :  { %1941 = vsyncpa [#allocation4], 1 }
 0x20b   :  { %1943 = vsyncpa [#allocation4 + $0x1], 1 }

</bundles_post_ra>
